<compile_context>
chip_gen: v7x
topology: tpu7x:2x2x1
jax: 0.10.0
libtpu: 0.0.40
codegen_flags: <defaults>
</compile_context>

<pallas_src>
import jax
import jax.numpy as jnp
from jax.experimental import pallas as pl
from jax.experimental.pallas import tpu as pltpu


def critic_kernel(x_ref, w1_ref, b1_ref, w2_ref, b2_ref, w3_ref, b3_ref, out_ref):
    # Layer 1: Linear + ReLU (MXU matmul, f32 accumulation).
    x = x_ref[...].astype(w1_ref.dtype)
    h1 = jnp.dot(x, w1_ref[...], preferred_element_type=jnp.float32)
    h1 = jnp.maximum(h1 + b1_ref[...], 0.0)

    # Layer 2: Linear + ReLU.
    h2 = jnp.dot(h1.astype(w2_ref.dtype), w2_ref[...],
                 preferred_element_type=jnp.float32)
    h2 = jnp.maximum(h2 + b2_ref[...], 0.0)

    # Output head (hidden -> 1) kept off the MXU: elementwise multiply (VPU) and
    # a lane reduction (XLU).  Result is stored lane-dense as a (1, TILE_B) row.
    v = jnp.sum(h2 * w3_ref[...], axis=-1)                      # (TILE_B,)
    out_ref[...] = (v.reshape(1, -1) + b3_ref[...]).astype(out_ref.dtype)


def _round_up(x, m):
    return ((x + m - 1) // m) * m


def _choose_batch_tile(B, tile_b):
    """Batch tile: the full (8-aligned) array for tiny batches; otherwise a
    128-aligned tile (lane-dense output block), capped so that there are at
    least 2 grid steps (keeps both v7x TensorCores busy)."""
    b8 = _round_up(B, 8)
    if b8 <= 128:
        return b8                                   # single tile == padded array
    cap = max(128, (int(tile_b) // 128) * 128)      # output lane dim must be 128-aligned
    half = _round_up(pl.cdiv(B, 2), 128)            # force >= 2 grid steps
    return min(cap, half)


def critic_forward(state, params, *, tile_b=4096, matmul_dtype=jnp.bfloat16,
                   vmem_limit_bytes=48 * 1024 * 1024):
    """Pallas Critic forward.  state: (B, state_size) f32  ->  (B, 1) f32.

    matmul_dtype: bf16 by default (f32 accumulation kept via
    preferred_element_type) -- the native MXU path on v5e/v6e/v7x.  Pass
    jnp.float32 for bit-tight accuracy (e.g. numerics tests).
    """
    B, S = state.shape
    w1 = params["w1"].astype(matmul_dtype)
    w2 = params["w2"].astype(matmul_dtype)
    b1, b2 = params["b1"], params["b2"]
    w3, b3 = params["w3"], params["b3"]

    tb = _choose_batch_tile(B, tile_b)
    num_tiles = pl.cdiv(B, tb)
    b_padded = num_tiles * tb
    # NOTE: the state is deliberately NOT padded.  Pallas pads the trailing
    # partial batch block internally, so ragged B costs no extra HBM copy; the
    # garbage rows only produce garbage output lanes that are sliced off below.

    # Weights / biases: full-array blocks with constant index_maps -> DMA'd once
    # and VMEM-resident across all grid steps.  (Single-buffering them via
    # pipeline_mode=pl.Buffered(1) would shave a little more VMEM but is not
    # needed at these sizes.)
    const = lambda a: pl.BlockSpec(a.shape, lambda i, _n=a.ndim: (0,) * _n)

    out = pl.pallas_call(
        critic_kernel,
        out_shape=jax.ShapeDtypeStruct((1, b_padded), jnp.float32),
        grid=(num_tiles,),
        in_specs=[
            pl.BlockSpec((tb, S), lambda i: (i, 0)),   # batch-tiled state
            const(w1), const(b1),
            const(w2), const(b2),
            const(w3), const(b3),
        ],
        out_specs=pl.BlockSpec((1, tb), lambda i: (0, i)),   # lane-dense output row
        compiler_params=pltpu.CompilerParams(
            dimension_semantics=("parallel",),
            vmem_limit_bytes=int(vmem_limit_bytes),
        ),
    )(state, w1, b1, w2, b2, w3, b3)

    # Lane-dense (1, B_padded) row -> canonical (B, 1) column, drop batch padding.
    return out.reshape(b_padded, 1)[:B]


def init_params(key, state_size, hidden=(256, 256)):
    """Deterministic init mimicking nn.Linear default (uniform +/- 1/sqrt(fan_in))."""
    assert len(hidden) == 2, "kernel implements the default 2-hidden-layer Critic"
    dims = [state_size] + list(hidden)
    keys = jax.random.split(key, 2 * len(dims))
    params = {}
    # Hidden layers: weights stored as (in, out) == PyTorch W.T
    for i, (din, dout) in enumerate(zip(dims[:-1], dims[1:])):
        bound = 1.0 / float(din) ** 0.5
        params[f"w{i+1}"] = jax.random.uniform(
            keys[2 * i], (din, dout), jnp.float32, -bound, bound)
        params[f"b{i+1}"] = jax.random.uniform(
            keys[2 * i + 1], (1, dout), jnp.float32, -bound, bound)
    # Output head: stored as a (1, hidden[-1]) row (PyTorch-native (out, in)).
    h_last = dims[-1]
    bound = 1.0 / float(h_last) ** 0.5
    params["w3"] = jax.random.uniform(keys[-2], (1, h_last), jnp.float32, -bound, bound)
    params["b3"] = jax.random.uniform(keys[-1], (1, 1), jnp.float32, -bound, bound)
    return params


def critic_reference(state, params):
    x = jnp.maximum(state @ params["w1"] + params["b1"], 0.0)
    x = jnp.maximum(x @ params["w2"] + params["b2"], 0.0)
    return x @ params["w3"].T + params["b3"]


if __name__ == "__main__":
    key = jax.random.PRNGKey(0)
    k_param, k_state = jax.random.split(key)

    # Small demo shapes; B is a non-multiple of 128 to exercise the partial
    # trailing tile (no input padding) and a multi-step parallel grid.
    B, STATE_SIZE = 300, 32
    HIDDEN = (64, 64)

    params = init_params(k_param, STATE_SIZE, HIDDEN)
    state = jax.random.normal(k_state, (B, STATE_SIZE), dtype=jnp.float32)
    ref = critic_reference(state, params)

    # 1) Default fast path: bf16 MXU inputs, large-tile heuristic (2 grid steps).
    values = critic_forward(state, params)
    jax.block_until_ready(values)
    assert values.shape == (B, 1)
    bf16_err = float(jnp.max(jnp.abs(values - ref)))
    assert jnp.allclose(values, ref, atol=1e-1, rtol=1e-1), f"bf16 max_err={bf16_err}"

    # 2) Bit-tight f32 path with a small explicit tile (3 grid steps).
    values_f32 = critic_forward(state, params, tile_b=128, matmul_dtype=jnp.float32)
    jax.block_until_ready(values_f32)
    f32_err = float(jnp.max(jnp.abs(values_f32 - ref)))
    assert jnp.allclose(values_f32, ref, atol=1e-4, rtol=1e-4), f"f32 max_err={f32_err}"

    print("KERNEL_OK")
</pallas_src>

<mosaic_0001>
module attributes {stable_mosaic.version = 11 : i64} {
  func.func @critic_kernel(%arg0: i32, %arg1: memref<256x32xf32, #tpu.memory_space<vmem>>, %arg2: memref<32x64xbf16, #tpu.memory_space<vmem>>, %arg3: memref<1x64xf32, #tpu.memory_space<vmem>>, %arg4: memref<64x64xbf16, #tpu.memory_space<vmem>>, %arg5: memref<1x64xf32, #tpu.memory_space<vmem>>, %arg6: memref<1x64xf32, #tpu.memory_space<vmem>>, %arg7: memref<1x1xf32, #tpu.memory_space<vmem>>, %arg8: memref<1x256xf32, #tpu.memory_space<vmem>>) attributes {dimension_semantics = [#tpu.dimension_semantics<parallel>], iteration_bounds = array<i64: 2>, scalar_prefetch = 0 : i64, scratch_operands = 0 : i64, tpu.core_type = #tpu.core_type<tc>, window_params = [{transform_indices = @transform_0, window_bounds = array<i64: 256, 32>}, {pipeline_mode = #tpu.pipeline_mode<synchronous>, transform_indices = @transform_1, window_bounds = array<i64: 32, 64>}, {pipeline_mode = #tpu.pipeline_mode<synchronous>, transform_indices = @transform_2, window_bounds = array<i64: 1, 64>}, {pipeline_mode = #tpu.pipeline_mode<synchronous>, transform_indices = @transform_3, window_bounds = array<i64: 64, 64>}, {pipeline_mode = #tpu.pipeline_mode<synchronous>, transform_indices = @transform_4, window_bounds = array<i64: 1, 64>}, {pipeline_mode = #tpu.pipeline_mode<synchronous>, transform_indices = @transform_5, window_bounds = array<i64: 1, 64>}, {pipeline_mode = #tpu.pipeline_mode<synchronous>, transform_indices = @transform_6, window_bounds = array<i64: 1, 1>}, {transform_indices = @transform_7, window_bounds = array<i64: 1, 256>}]} {
    %c0 = arith.constant 0 : index
    %c0_0 = arith.constant 0 : index
    %0 = vector.load %arg1[%c0, %c0_0] : memref<256x32xf32, #tpu.memory_space<vmem>>, vector<256x32xf32>
    %1 = arith.truncf %0 : vector<256x32xf32> to vector<256x32xbf16>
    %c0_1 = arith.constant 0 : index
    %c0_2 = arith.constant 0 : index
    %2 = vector.load %arg2[%c0_1, %c0_2] : memref<32x64xbf16, #tpu.memory_space<vmem>>, vector<32x64xbf16>
    %cst = arith.constant dense<0.000000e+00> : vector<256x64xf32>
    %3 = tpu.matmul %1, %2, %cst {dimension_numbers = #tpu.dot_dimension_numbers<[1], [0], [0], [1], [0, 0, 1, 1], [], []>} : vector<256x32xbf16>, vector<32x64xbf16>, vector<256x64xf32> -> vector<256x64xf32>
    %c0_3 = arith.constant 0 : index
    %c0_4 = arith.constant 0 : index
    %4 = vector.load %arg3[%c0_3, %c0_4] : memref<1x64xf32, #tpu.memory_space<vmem>>, vector<1x64xf32>
    %5 = vector.broadcast %4 : vector<1x64xf32> to vector<256x64xf32>
    %6 = arith.addf %3, %5 : vector<256x64xf32>
    %cst_5 = arith.constant 0.000000e+00 : f32
    %7 = vector.broadcast %cst_5 : f32 to vector<256x64xf32>
    %8 = arith.maximumf %6, %7 : vector<256x64xf32>
    %9 = arith.truncf %8 : vector<256x64xf32> to vector<256x64xbf16>
    %c0_6 = arith.constant 0 : index
    %c0_7 = arith.constant 0 : index
    %10 = vector.load %arg4[%c0_6, %c0_7] : memref<64x64xbf16, #tpu.memory_space<vmem>>, vector<64x64xbf16>
    %cst_8 = arith.constant dense<0.000000e+00> : vector<256x64xf32>
    %11 = tpu.matmul %9, %10, %cst_8 {dimension_numbers = #tpu.dot_dimension_numbers<[1], [0], [0], [1], [0, 0, 1, 1], [], []>} : vector<256x64xbf16>, vector<64x64xbf16>, vector<256x64xf32> -> vector<256x64xf32>
    %c0_9 = arith.constant 0 : index
    %c0_10 = arith.constant 0 : index
    %12 = vector.load %arg5[%c0_9, %c0_10] : memref<1x64xf32, #tpu.memory_space<vmem>>, vector<1x64xf32>
    %13 = vector.broadcast %12 : vector<1x64xf32> to vector<256x64xf32>
    %14 = arith.addf %11, %13 : vector<256x64xf32>
    %cst_11 = arith.constant 0.000000e+00 : f32
    %15 = vector.broadcast %cst_11 : f32 to vector<256x64xf32>
    %16 = arith.maximumf %14, %15 : vector<256x64xf32>
    %c0_12 = arith.constant 0 : index
    %c0_13 = arith.constant 0 : index
    %17 = vector.load %arg6[%c0_12, %c0_13] : memref<1x64xf32, #tpu.memory_space<vmem>>, vector<1x64xf32>
    %18 = vector.broadcast %17 : vector<1x64xf32> to vector<256x64xf32>
    %19 = arith.mulf %16, %18 : vector<256x64xf32>
    %cst_14 = arith.constant dense<0.000000e+00> : vector<256xf32>
    %20 = vector.multi_reduction <add>, %19, %cst_14 [1] : vector<256x64xf32> to vector<256xf32>
    %21 = vector.shape_cast %20 : vector<256xf32> to vector<1x256xf32>
    %c0_15 = arith.constant 0 : index
    %c0_16 = arith.constant 0 : index
    %22 = vector.load %arg7[%c0_15, %c0_16] : memref<1x1xf32, #tpu.memory_space<vmem>>, vector<1x1xf32>
    %23 = vector.broadcast %22 : vector<1x1xf32> to vector<1x256xf32>
    %24 = arith.addf %21, %23 : vector<1x256xf32>
    %c0_17 = arith.constant 0 : index
    %c0_18 = arith.constant 0 : index
    %25 = vector.load %arg8[%c0_17, %c0_18] : memref<1x256xf32, #tpu.memory_space<vmem>>, vector<1x256xf32>
    tpu.vector_store %arg8[%c0_17, %c0_18], %24 {strides = array<i32>} : memref<1x256xf32, #tpu.memory_space<vmem>>, vector<1x256xf32>,
    return
  }
  func.func @transform_0(%arg0: i32) -> (i32, i32) {
    %c0_i32 = arith.constant 0 : i32
    %c0_i32_0 = arith.constant 0 : i32
    return %arg0, %c0_i32 : i32, i32
  }
  func.func @transform_1(%arg0: i32) -> (i32, i32) {
    %c0_i32 = arith.constant 0 : i32
    %c0_i32_0 = arith.constant 0 : i32
    %c0_i32_1 = arith.constant 0 : i32
    return %c0_i32, %c0_i32_0 : i32, i32
  }
  func.func @transform_2(%arg0: i32) -> (i32, i32) {
    %c0_i32 = arith.constant 0 : i32
    %c0_i32_0 = arith.constant 0 : i32
    %c0_i32_1 = arith.constant 0 : i32
    return %c0_i32, %c0_i32_0 : i32, i32
  }
  func.func @transform_3(%arg0: i32) -> (i32, i32) {
    %c0_i32 = arith.constant 0 : i32
    %c0_i32_0 = arith.constant 0 : i32
    %c0_i32_1 = arith.constant 0 : i32
    return %c0_i32, %c0_i32_0 : i32, i32
  }
  func.func @transform_4(%arg0: i32) -> (i32, i32) {
    %c0_i32 = arith.constant 0 : i32
    %c0_i32_0 = arith.constant 0 : i32
    %c0_i32_1 = arith.constant 0 : i32
    return %c0_i32, %c0_i32_0 : i32, i32
  }
  func.func @transform_5(%arg0: i32) -> (i32, i32) {
    %c0_i32 = arith.constant 0 : i32
    %c0_i32_0 = arith.constant 0 : i32
    %c0_i32_1 = arith.constant 0 : i32
    return %c0_i32, %c0_i32_0 : i32, i32
  }
  func.func @transform_6(%arg0: i32) -> (i32, i32) {
    %c0_i32 = arith.constant 0 : i32
    %c0_i32_0 = arith.constant 0 : i32
    %c0_i32_1 = arith.constant 0 : i32
    return %c0_i32, %c0_i32_0 : i32, i32
  }
  func.func @transform_7(%arg0: i32) -> (i32, i32) {
    %c0_i32 = arith.constant 0 : i32
    %c0_i32_0 = arith.constant 0 : i32
    return %c0_i32, %arg0 : i32, i32
  }
}

</mosaic_0001>

<bundles_post_ra>
// kernel: tpu_custom_call.1
= control target key start
LH: loop header
LB: loop body
LE: loop exit
PB: predicated region body
PF: predicated region fallthrough
CT: control target
= control target key end

     0   :  { %s5654_s0 = inlined_call_operand.vmem [shape: f32[300,32], index: 0, kind: input, shape index: {}]   ;;  %s5655_s1 = inlined_call_operand.vmem [shape: bf16[32,64], index: 1, kind: input, shape index: {}]   ;;  %s5656_s2 = inlined_call_operand.vmem [shape: f32[1,64], index: 2, kind: input, shape index: {}]   ;;  %s5657_s3 = inlined_call_operand.vmem [shape: bf16[64,64], index: 3, kind: input, shape index: {}]   ;;  %s5658_s4 = inlined_call_operand.vmem [shape: f32[1,64], index: 4, kind: input, shape index: {}]   ;;  %s5659_s5 = inlined_call_operand.vmem [shape: f32[1,64], index: 5, kind: input, shape index: {}]   ;;  %s5660_s6 = inlined_call_operand.<no memory space> [shape: f32[1,1], index: 6, kind: input, shape index: {}]   ;;  %s5661_s7 = inlined_call_operand.hbm [shape: f32[1,512], index: 7, kind: output, shape index: {}]  }
   0x1   :  { %v12_v0 = vstv %s5660_s6 }
   0x2   :  { %13 = vst [vmem:[#allocation2] sm:$0x1] %v12_v0 }
   0x3   :  { %14 = vsyncpa [#allocation4], 0 }
   0x4   :  { %16 = vsyncpa [#allocation4 + $0x1], 0  ;;  %s4422_s26 = smov 0   ;;  %s4424_s27 = smov 0  }
   0x5   :  { %s4426_s28 = smov 0   ;;  %s4428_s29 = smov 0  }
   0x6 LB: > { %s4094_s6 = sadd.s32 4294967295, %s4374_s29   ;;  %s4095_s30 = sadd.s32 4294967294, %s4374_s29   ;;  %s4374_s29 = sphi %s4428_s29, %s5667_s29   ;;  %s4370_s28 = sphi %s4426_s28, %s5666_s28   ;;  %s4366_s27 = sphi %s4424_s27, %s5665_s27   ;;  %s4362_s26 = sphi %s4422_s26, %s5664_s26  }
   0x7   : > { %s4445_s8 = sadd.s32 1, %s4374_s29   ;;  %s181_s9 = sadd.s32 1, %s4370_s28 }
   0x8   : > { %s178_s10 = ssub.s32 %s4374_s29, %s4445_s8  ;;  %p191_p0 = scmp.ne.s32.totalorder %s4370_s28, %s4366_s27 }
   0x9   : > { %p179_p1 = scmp.eq.s32.totalorder %s178_s10, 0  ;;  %p192_p2 = scmp.eq.s32.totalorder %s4094_s6, 1 }
   0xa   : > { %p197_p3 = scmp.ne.s32.totalorder %s4366_s27, %s4362_s26  ;;  %p198_p4 = scmp.eq.s32.totalorder %s4095_s30, 1 }
   0xb   : > { %s4455_s11 = scalar_select %p179_p1, %s4370_s28, %s181_s9  }
   0xc   : > { %p4457_p5 = por %p192_p2, %p191_p0  ;;  %p4461_p6 = por %p198_p4, %p197_p3 }
   0xd   : > { %p4098_p7 = scmp.ge.s32.totalorder %s4374_s29, 1  ;;  %p251_p8 = scmp.lt.s32.totalorder %s4374_s29, 3 }
   0xf   : > { %p252_p9 = pnand %p4098_p7, %p251_p8 }
  0x10   : > { %v4306_v1 = vld [vmem:[%s5655_s1] sm:$0xff] (!%p252_p9)   ;;  %s4470_s16 = sshll.u32 (!%p252_p9), %s4094_s6, 5  ;;  %v4307_v2 = vld [vmem:[%s5655_s1 + $0x8] sm:$0xff] (!%p252_p9)   ;;  %vm374_vm0 = vcmask (!%p252_p9), 261120   ;;  %v4310_v53 = vld [vmem:[%s5657_s3 + $0x10] sm:$0xff] (!%p252_p9)   ;;  %v4376_v56 = vmov (!%p252_p9), 0  }
  0x11   : > { %255 = sbr.rel (%p252_p9) target bundleno = 951 (0x3b7), region = 48  ;;  %p292_p10 = scmp.lt.s32.totalorder (!%p252_p9), %s4470_s16, 37  ;;  %4187 = vmatprep.subr.bf16.mxu0 (!%p252_p9), %v4306_v1  ;;  %v4308_v3 = vld [vmem:[%s5657_s3] sm:$0xff] (!%p252_p9)   ;;  %v4309_v4 = vld [vmem:[%s5657_s3 + $0x8] sm:$0xff] (!%p252_p9)   ;;  %v4311_v54 = vld [vmem:[%s5657_s3 + $0x18] sm:$0xff] (!%p252_p9)   ;;  %4304 = vset.pattern.permute.xlu1 (!%p252_p9), %v4376_v56  ;;  %vm671_vm1 = vcmask (!%p252_p9), 523264  }
  0x12   : > { %4188 = vmatpush3.bf16.msra.mxu0 (!%p252_p9), %v4306_v1  ;;  %4223 = vmatprep.subr.bf16.mxu1 (!%p252_p9), %v4308_v3  ;;  %v1048_v55 = vld [vmem:[#allocation2] sm:$0x1] (!%p252_p9)  ;;  %vm3821_vm2 = vcmask (!%p252_p9), 130112   ;;  %vm3828_vm3 = vcmask (!%p252_p9), 195712   ;;  %vm3835_vm4 = vcmask (!%p252_p9), 261312   ;;  %vm3842_vm5 = vcmask (!%p252_p9), 326912   ;;  %s5610_s10 = scalar_lea.hbm (!%p252_p9), %s5661_s7, %s4470_s16 }
  0x13   : > { %4189 = vmatprep.subr.bf16.mxu0 (!%p252_p9), %v4307_v2  ;;  %4224 = vmatpush3.bf16.msra.mxu1 (!%p252_p9), %v4308_v3  ;;  %v4545_v57 = vld [vmem:[%s5656_s2] ss:$0 sm:$0xff] (!%p252_p9)  ;;  %vm3849_vm6 = vcmask (!%p252_p9), 392512   ;;  %vm3856_vm7 = vcmask (!%p252_p9), 458112   ;;  %vm3863_vm8 = vcmask (!%p252_p9), 523712   ;;  %vm3870_vm9 = vcmask (!%p252_p9), 589312  }
  0x14   : > { %4225 = vmatprep.subr.bf16.mxu1 (!%p252_p9), %v4309_v4  ;;  %4305 = vset.pattern.permute.xlu0 (!%p252_p9), %v4376_v56  ;;  %vm3877_vm10 = vcmask (!%p252_p9), 654912   ;;  %vm3884_vm11 = vcmask (!%p252_p9), 720512   ;;  %vm3891_vm12 = vcmask (!%p252_p9), 786112   ;;  %s284_s23 = sand.u32 (!%p252_p9), 1, %s4366_s27   ;;  %vm3898_vm13 = vcmask (!%p252_p9), 851712   ;;  %s4378_s17 = smov (!%p252_p9), [#allocation3]  }
  0x15   : > { %1051 = vperm.xlu1 (!%p252_p9), %4304, %v1048_v55   ;;  %vm3905_vm14 = vcmask (!%p252_p9), 917312   ;;  %vm3912_vm15 = vcmask (!%p252_p9), 982912   ;;  %s4022_s14 = scalar_lea.sflag (!%p252_p9), [#allocation4], %s284_s23  ;;  %s4316_s18 = sshll.u32 (!%p252_p9), %s4378_s17, 4  ;;  %s4317_s18 = int_to_ptr.vmem [resolvable:$false] %s4316_s18 }
  0x16   : > { %4190 = vmatpush3.bf16.msra.mxu0 (!%p252_p9), %v4307_v2  ;;  %s4318_s19 = scalar_lea.vmem (!%p252_p9), %s4317_s18, 64 }
  0x17   : > { %4226 = vmatpush3.bf16.msra.mxu1 (!%p252_p9), %v4309_v4 }
  0x18   : > { %s293_s21 = scalar_select %p292_p10, %s4470_s16, 37  ;;  %4227 = vmatprep.subr.bf16.mxu1 %v4310_v53 }
  0x1a   : > { %s4101_s24 = sshll.u32 %s293_s21, 3 }
  0x1b   : > { %s4486_s30 = scalar_lea.vmem %s5654_s0, %s4101_s24  ;;  %4228 = vmatpush3.bf16.msra.mxu1 %v4310_v53  ;;  %s4099_s24 = sshll.u32 %s284_s23, 1 }
  0x1c   : > { %v303_v5 = vld [vmem:[%s4486_s30] sm:$0xff]  ;;  %v304_v6 = vld [vmem:[%s4486_s30 + $0x8] sm:$0xff]  ;;  %v305_v7 = vld [vmem:[%s4486_s30 + $0x10] sm:$0xff]  ;;  %4229 = vmatprep.subr.bf16.mxu1 %v4311_v54  ;;  %s286_s25 = scalar_lea.vmem [#allocation3], %s4099_s24 }
  0x1d   : > { %v335_v8 = vpack.c.bf16 %v304_v6, %v303_v5  ;;  %v306_v9 = vld [vmem:[%s4486_s30 + $0x18] sm:$0xff]  ;;  %v307_v10 = vld [vmem:[%s4486_s30 + $0x20] sm:$0xff]  ;;  %v308_v11 = vld [vmem:[%s4486_s30 + $0x28] sm:$0xff]  ;;  %s4036_s6 = sshll.u32 %s286_s25, 4  ;;  %s5612_s6 = int_to_ptr.vmem [resolvable:$true] %s4036_s6 }
  0x1e   : > { %v336_v12 = vpack.c.bf16 %v306_v9, %v305_v7  ;;  %v337_v13 = vpack.c.bf16 %v308_v11, %v307_v10  ;;  %v309_v14 = vld [vmem:[%s4486_s30 + $0x30] sm:$0xff]  ;;  %v310_v15 = vld [vmem:[%s4486_s30 + $0x38] sm:$0xff]  ;;  %v311_v16 = vld [vmem:[%s4486_s30 + $0x40] sm:$0xff]  ;;  %s4312_s15 = scalar_lea.vmem %s5612_s6, 32  ;;  %p4319_p0 = scmp.lt.s32.totalorder %s5612_s6, %s4317_s18 }
  0x1f   : > { %4191 = vmatprep.mubr.msk.bf16.mxu0 %vm374_vm0, %v335_v8  ;;  %v312_v17 = vld [vmem:[%s4486_s30 + $0x48] sm:$0xff]  ;;  %v338_v18 = vpack.c.bf16 %v310_v15, %v309_v14  ;;  %v313_v20 = vld [vmem:[%s4486_s30 + $0x50] sm:$0xff]  ;;  %v314_v21 = vld [vmem:[%s4486_s30 + $0x58] sm:$0xff]  ;;  %4230 = vmatpush3.bf16.msra.mxu1 %v4311_v54  ;;  %p4313_p11 = scmp.ne.s32.totalorder %s5612_s6, %s4312_s15  ;;  %p4320_p1 = scmp.lt.s32.totalorder %s4318_s19, %s4312_s15 }
  0x20   : > { %4192 = vmatmul.mubr.msk.bf16.vlgmr.msra.gmra.mrb[0].mxu0 %vm374_vm0, %v336_v12  ;;  %v339_v19 = vpack.c.bf16 %v312_v17, %v311_v16  ;;  %v315_v22 = vld [vmem:[%s4486_s30 + $0x60] sm:$0xff]  ;;  %v316_v23 = vld [vmem:[%s4486_s30 + $0x68] sm:$0xff]  ;;  %v340_v24 = vpack.c.bf16 %v314_v21, %v313_v20  ;;  %v317_v26 = vld [vmem:[%s4486_s30 + $0x70] sm:$0xff] }
  0x21   : > { %4195 = vmatprep.mubr.msk.bf16.mxu0 %vm374_vm0, %v337_v13  ;;  %v341_v25 = vpack.c.bf16 %v316_v23, %v315_v22  ;;  %v318_v27 = vld [vmem:[%s4486_s30 + $0x78] sm:$0xff]  ;;  %v319_v28 = vld [vmem:[%s4486_s30 + $0x80] sm:$0xff]  ;;  %v320_v29 = vld [vmem:[%s4486_s30 + $0x88] sm:$0xff]  ;;  %p4314_p12 = pnand %p4313_p11, %p4457_p5  ;;  %p4321_p2 = por %p4320_p1, %p4319_p0 }
  0x22   : > { %v342_v30 = vpack.c.bf16 %v318_v27, %v317_v26  ;;  %v343_v31 = vpack.c.bf16 %v320_v29, %v319_v28  ;;  %v321_v32 = vld [vmem:[%s4486_s30 + $0x90] sm:$0xff]  ;;  %v322_v33 = vld [vmem:[%s4486_s30 + $0x98] sm:$0xff]  ;;  %v323_v34 = vld [vmem:[%s4486_s30 + $0xa0] sm:$0xff] }
  0x23   : > { %v324_v35 = vld [vmem:[%s4486_s30 + $0xa8] sm:$0xff]  ;;  %v344_v36 = vpack.c.bf16 %v322_v33, %v321_v32  ;;  %v325_v38 = vld [vmem:[%s4486_s30 + $0xb0] sm:$0xff]  ;;  %v326_v39 = vld [vmem:[%s4486_s30 + $0xb8] sm:$0xff]  ;;  %p4315_p13 = pneg %p4314_p12 }
  0x24   : > { %v345_v37 = vpack.c.bf16 %v324_v35, %v323_v34  ;;  %v327_v40 = vld [vmem:[%s4486_s30 + $0xc0] sm:$0xff]  ;;  %v328_v41 = vld [vmem:[%s4486_s30 + $0xc8] sm:$0xff]  ;;  %v346_v42 = vpack.c.bf16 %v326_v39, %v325_v38  ;;  %v329_v44 = vld [vmem:[%s4486_s30 + $0xd0] sm:$0xff] }
  0x25   : > { %v347_v43 = vpack.c.bf16 %v328_v41, %v327_v40  ;;  %v330_v45 = vld [vmem:[%s4486_s30 + $0xd8] sm:$0xff]  ;;  %v331_v46 = vld [vmem:[%s4486_s30 + $0xe0] sm:$0xff]  ;;  %v332_v47 = vld [vmem:[%s4486_s30 + $0xe8] sm:$0xff]  ;;  %p4322_p3 = pnand %p4321_p2, %p4315_p13 }
  0x26   : > { %v348_v48 = vpack.c.bf16 %v330_v45, %v329_v44  ;;  %v349_v49 = vpack.c.bf16 %v332_v47, %v331_v46  ;;  %v333_v50 = vld [vmem:[%s4486_s30 + $0xf0] sm:$0xff]  ;;  %v334_v51 = vld [vmem:[%s4486_s30 + $0xf8] sm:$0xff] }
  0x27   : > { %v350_v52 = vpack.c.bf16 %v334_v51, %v333_v50 }
  0x28   : > { %4196 = vmatmul.mubr.msk.bf16.gmra.mrb[4].mxu0 %vm374_vm0, %v338_v18 }
  0x29   : > { %4199 = vmatprep.mubr.msk.bf16.mxu0 %vm374_vm0, %v339_v19 }
  0x30   : > { %4200 = vmatmul.mubr.msk.bf16.gmra.mrb[8].mxu0 %vm374_vm0, %v340_v24 }
  0x31   : > { %4203 = vmatprep.mubr.msk.bf16.mxu0 %vm374_vm0, %v341_v25 }
  0x38   : > { %4204 = vmatmul.mubr.msk.bf16.gmra.mrb[12].mxu0 %vm374_vm0, %v342_v30 }
  0x39   : > { %4207 = vmatprep.mubr.msk.bf16.mxu0 %vm374_vm0, %v343_v31 }
  0x40   : > { %4208 = vmatmul.mubr.msk.bf16.gmra.mrb[16].mxu0 %vm374_vm0, %v344_v36 }
  0x41   : > { %4211 = vmatprep.mubr.msk.bf16.mxu0 %vm374_vm0, %v345_v37 }
  0x48   : > { %4212 = vmatmul.mubr.msk.bf16.gmra.mrb[20].mxu0 %vm374_vm0, %v346_v42 }
  0x49   : > { %4215 = vmatprep.mubr.msk.bf16.mxu0 %vm374_vm0, %v347_v43 }
  0x50   : > { %4216 = vmatmul.mubr.msk.bf16.gmra.mrb[24].mxu0 %vm374_vm0, %v348_v48 }
  0x51   : > { %4219 = vmatprep.mubr.msk.bf16.mxu0 %vm374_vm0, %v349_v49 }
  0x58   : > { %4220 = vmatmul.mubr.msk.bf16.gmra.mrb[28].mxu0 %vm374_vm0, %v350_v52  ;;  %vm3919_vm0 = vcmask 1048512  }
  0xf3   : > { %v4193_v58 = vpop.f32.mrb[0].mxu0 }
  0xf4   : > { %v466_v59 = vadd.f32 %v4193_v58, %v4545_v57  ;;  %v457_v60 = vpop.f32.mrb[1].mxu0 }
  0xf5   : > { %v458_v61 = vadd.f32 %v4545_v57, %v457_v60  ;;  %v4194_v62 = vpop.f32.mrb[2].mxu0 }
  0xf6   : > { %v469_v63 = vadd.f32 %v4194_v62, %v4545_v57  ;;  %v460_v0 = vpop.f32.mrb[3].mxu0  ;;  %v586_v2 = vmax.f32 %v466_v59, 0.0 }
  0xf7   : > { %v461_v1 = vadd.f32 %v4545_v57, %v460_v0  ;;  %v584_v4 = vmax.f32 %v458_v61, 0.0 }
  0xf8   : > { %v587_v3 = vmax.f32 %v469_v63, 0.0 }
  0xf9   : > { %v585_v5 = vmax.f32 %v461_v1, 0.0 }
  0xfa   : > { %v617_v6 = vpack.c.bf16 %v587_v3, %v586_v2 }
  0xfb   : > { %v4197_v7 = vpop.f32.mrb[4].mxu0  ;;  %v616_v8 = vpack.c.bf16 %v585_v5, %v584_v4 }
  0xfc   : > { %v482_v9 = vadd.f32 %v4197_v7, %v4545_v57  ;;  %v473_v10 = vpop.f32.mrb[5].mxu0 }
  0xfd   : > { %v474_v11 = vadd.f32 %v4545_v57, %v473_v10  ;;  %v4198_v12 = vpop.f32.mrb[6].mxu0  ;;  %4231 = vmatprep.mubr.msk.bf16.mxu1 %vm671_vm1, %v616_v8 }
  0xfe   : > { %v590_v13 = vmax.f32 %v482_v9, 0.0  ;;  %v485_v14 = vadd.f32 %v4198_v12, %v4545_v57  ;;  %v476_v15 = vpop.f32.mrb[7].mxu0  ;;  %4232 = vmatmul.mubr.msk.bf16.vlgmr.msra.gmra.mrb[0].mxu1 %vm671_vm1, %v617_v6 }
  0xff   : > { %v477_v16 = vadd.f32 %v4545_v57, %v476_v15  ;;  %v588_v18 = vmax.f32 %v474_v11, 0.0 }
 0x100   : > { %v591_v17 = vmax.f32 %v485_v14, 0.0 }
 0x101   : > { %v589_v19 = vmax.f32 %v477_v16, 0.0 }
 0x102   : > { %v619_v20 = vpack.c.bf16 %v591_v17, %v590_v13 }
 0x103   : > { %v618_v21 = vpack.c.bf16 %v589_v19, %v588_v18  ;;  %v4201_v22 = vpop.f32.mrb[8].mxu0 }
 0x104   : > { %v498_v23 = vadd.f32 %v4201_v22, %v4545_v57  ;;  %v489_v24 = vpop.f32.mrb[9].mxu0 }
 0x105   : > { %v490_v25 = vadd.f32 %v4545_v57, %v489_v24  ;;  %v4202_v26 = vpop.f32.mrb[10].mxu0  ;;  %4235 = vmatprep.mubr.msk.bf16.mxu1 %vm671_vm1, %v618_v21 }
 0x106   : > { %v594_v27 = vmax.f32 %v498_v23, 0.0  ;;  %v501_v28 = vadd.f32 %v4202_v26, %v4545_v57  ;;  %v492_v29 = vpop.f32.mrb[11].mxu0  ;;  %4236 = vmatmul.mubr.msk.bf16.gmra.mrb[4].mxu1 %vm671_vm1, %v619_v20 }
 0x107   : > { %v493_v30 = vadd.f32 %v4545_v57, %v492_v29  ;;  %v592_v32 = vmax.f32 %v490_v25, 0.0 }
 0x108   : > { %v595_v31 = vmax.f32 %v501_v28, 0.0 }
 0x109   : > { %v593_v33 = vmax.f32 %v493_v30, 0.0 }
 0x10a   : > { %v621_v34 = vpack.c.bf16 %v595_v31, %v594_v27 }
 0x10b   : > { %v620_v35 = vpack.c.bf16 %v593_v33, %v592_v32  ;;  %v4205_v36 = vpop.f32.mrb[12].mxu0 }
 0x10c   : > { %v514_v37 = vadd.f32 %v4205_v36, %v4545_v57  ;;  %v505_v38 = vpop.f32.mrb[13].mxu0 }
 0x10d   : > { %v506_v39 = vadd.f32 %v4545_v57, %v505_v38  ;;  %v4206_v40 = vpop.f32.mrb[14].mxu0  ;;  %4239 = vmatprep.mubr.msk.bf16.mxu1 %vm671_vm1, %v620_v35 }
 0x10e   : > { %v598_v41 = vmax.f32 %v514_v37, 0.0  ;;  %v517_v42 = vadd.f32 %v4206_v40, %v4545_v57  ;;  %v508_v43 = vpop.f32.mrb[15].mxu0  ;;  %4240 = vmatmul.mubr.msk.bf16.gmra.mrb[8].mxu1 %vm671_vm1, %v621_v34 }
 0x10f   : > { %v509_v44 = vadd.f32 %v4545_v57, %v508_v43  ;;  %v596_v46 = vmax.f32 %v506_v39, 0.0  ;;  %v4598_v43 = vld [vmem:[%s5658_s4] ss:$0 sm:$0xff] }
 0x110   : > { %v599_v45 = vmax.f32 %v517_v42, 0.0 }
 0x111   : > { %v597_v47 = vmax.f32 %v509_v44, 0.0 }
 0x112   : > { %v623_v48 = vpack.c.bf16 %v599_v45, %v598_v41 }
 0x113   : > { %v622_v49 = vpack.c.bf16 %v597_v47, %v596_v46  ;;  %v4209_v50 = vpop.f32.mrb[16].mxu0 }
 0x114   : > { %v530_v51 = vadd.f32 %v4209_v50, %v4545_v57  ;;  %v521_v52 = vpop.f32.mrb[17].mxu0 }
 0x115   : > { %v522_v53 = vadd.f32 %v4545_v57, %v521_v52  ;;  %v4210_v54 = vpop.f32.mrb[18].mxu0  ;;  %4243 = vmatprep.mubr.msk.bf16.mxu1 %vm671_vm1, %v622_v49 }
 0x116   : > { %v602_v55 = vmax.f32 %v530_v51, 0.0  ;;  %v533_v56 = vadd.f32 %v4210_v54, %v4545_v57  ;;  %v524_v58 = vpop.f32.mrb[19].mxu0  ;;  %4244 = vmatmul.mubr.msk.bf16.gmra.mrb[12].mxu1 %vm671_vm1, %v623_v48  ;;  %v4605_v48 = vld [vmem:[%s5659_s5] ss:$0 sm:$0xff] }
 0x117   : > { %v525_v59 = vadd.f32 %v4545_v57, %v524_v58  ;;  %v600_v61 = vmax.f32 %v522_v53, 0.0 }
 0x118   : > { %v603_v60 = vmax.f32 %v533_v56, 0.0 }
 0x119   : > { %v601_v62 = vmax.f32 %v525_v59, 0.0 }
 0x11a   : > { %v625_v63 = vpack.c.bf16 %v603_v60, %v602_v55 }
 0x11b   : > { %v624_v0 = vpack.c.bf16 %v601_v62, %v600_v61  ;;  %v4213_v1 = vpop.f32.mrb[20].mxu0 }
 0x11c   : > { %v546_v2 = vadd.f32 %v4213_v1, %v4545_v57  ;;  %v537_v3 = vpop.f32.mrb[21].mxu0 }
 0x11d   : > { %v538_v4 = vadd.f32 %v4545_v57, %v537_v3  ;;  %v4214_v5 = vpop.f32.mrb[22].mxu0  ;;  %4247 = vmatprep.mubr.msk.bf16.mxu1 %vm671_vm1, %v624_v0 }
 0x11e   : > { %v606_v6 = vmax.f32 %v546_v2, 0.0  ;;  %v549_v7 = vadd.f32 %v4214_v5, %v4545_v57  ;;  %v540_v8 = vpop.f32.mrb[23].mxu0  ;;  %4248 = vmatmul.mubr.msk.bf16.gmra.mrb[16].mxu1 %vm671_vm1, %v625_v63 }
 0x11f   : > { %v541_v9 = vadd.f32 %v4545_v57, %v540_v8  ;;  %v604_v11 = vmax.f32 %v538_v4, 0.0 }
 0x120   : > { %v607_v10 = vmax.f32 %v549_v7, 0.0 }
 0x121   : > { %v605_v12 = vmax.f32 %v541_v9, 0.0 }
 0x122   : > { %v627_v13 = vpack.c.bf16 %v607_v10, %v606_v6 }
 0x123   : > { %v626_v14 = vpack.c.bf16 %v605_v12, %v604_v11  ;;  %v4217_v15 = vpop.f32.mrb[24].mxu0 }
 0x124   : > { %v562_v16 = vadd.f32 %v4217_v15, %v4545_v57  ;;  %v553_v17 = vpop.f32.mrb[25].mxu0 }
 0x125   : > { %v554_v18 = vadd.f32 %v4545_v57, %v553_v17  ;;  %v4218_v19 = vpop.f32.mrb[26].mxu0  ;;  %4251 = vmatprep.mubr.msk.bf16.mxu1 %vm671_vm1, %v626_v14 }
 0x126   : > { %v610_v20 = vmax.f32 %v562_v16, 0.0  ;;  %v565_v21 = vadd.f32 %v4218_v19, %v4545_v57  ;;  %v556_v22 = vpop.f32.mrb[27].mxu0  ;;  %4252 = vmatmul.mubr.msk.bf16.gmra.mrb[20].mxu1 %vm671_vm1, %v627_v13 }
 0x127   : > { %v608_v23 = vmax.f32 %v554_v18, 0.0  ;;  %v557_v24 = vadd.f32 %v4545_v57, %v556_v22 }
 0x128   : > { %v611_v25 = vmax.f32 %v565_v21, 0.0 }
 0x129   : > { %v609_v26 = vmax.f32 %v557_v24, 0.0 }
 0x12a   : > { %v629_v27 = vpack.c.bf16 %v611_v25, %v610_v20 }
 0x12b   : > { %v628_v28 = vpack.c.bf16 %v609_v26, %v608_v23  ;;  %v4221_v29 = vpop.f32.mrb[28].mxu0 }
 0x12c   : > { %v578_v30 = vadd.f32 %v4221_v29, %v4545_v57  ;;  %v569_v31 = vpop.f32.mrb[29].mxu0 }
 0x12d   : > { %4255 = vmatprep.mubr.msk.bf16.mxu1 %vm671_vm1, %v628_v28  ;;  %v570_v32 = vadd.f32 %v4545_v57, %v569_v31  ;;  %v4222_v33 = vpop.f32.mrb[30].mxu0 }
 0x12e   : > { %4256 = vmatmul.mubr.msk.bf16.gmra.mrb[24].mxu1 %vm671_vm1, %v629_v27  ;;  %v614_v34 = vmax.f32 %v578_v30, 0.0  ;;  %v581_v35 = vadd.f32 %v4222_v33, %v4545_v57  ;;  %v572_v36 = vpop.f32.mrb[31].mxu0 }
 0x12f   : > { %v612_v37 = vmax.f32 %v570_v32, 0.0  ;;  %v573_v38 = vadd.f32 %v4545_v57, %v572_v36 }
 0x130   : > { %v615_v39 = vmax.f32 %v581_v35, 0.0 }
 0x131   : > { %v613_v40 = vmax.f32 %v573_v38, 0.0 }
 0x132   : > { %v631_v41 = vpack.c.bf16 %v615_v39, %v614_v34 }
 0x133   : > { %v630_v42 = vpack.c.bf16 %v613_v40, %v612_v37 }
 0x135   : > { %4259 = vmatprep.mubr.msk.bf16.mxu1 %vm671_vm1, %v630_v42 }
 0x136   : > { %4260 = vmatmul.mubr.msk.bf16.gmra.mrb[28].mxu1 %vm671_vm1, %v631_v41 }
 0x1d1   : > { %v4233_v44 = vpop.f32.mrb[0].mxu1 }
 0x1d2   : > { %v763_v45 = vadd.f32 %v4233_v44, %v4598_v43  ;;  %v754_v46 = vpop.f32.mrb[1].mxu1 }
 0x1d3   : > { %v755_v47 = vadd.f32 %v4598_v43, %v754_v46  ;;  %v4234_v57 = vpop.f32.mrb[2].mxu1 }
 0x1d4   : > { %v883_v49 = vmax.f32 %v763_v45, 0.0  ;;  %v766_v50 = vadd.f32 %v4234_v57, %v4598_v43  ;;  %v757_v51 = vpop.f32.mrb[3].mxu1 }
 0x1d5   : > { %v881_v52 = vmax.f32 %v755_v47, 0.0  ;;  %v758_v53 = vadd.f32 %v4598_v43, %v757_v51 }
 0x1d6   : > { %v884_v54 = vmax.f32 %v766_v50, 0.0  ;;  %v922_v55 = vmul.f32 %v4605_v48, %v883_v49 }
 0x1d7   : > { %v882_v56 = vmax.f32 %v758_v53, 0.0  ;;  %v920_v58 = vmul.f32 %v4605_v48, %v881_v52 }
 0x1d8   : > { %v958_v59 = vsel %vm671_vm1, %v922_v55, 0.0  ;;  %v923_v60 = vmul.f32 %v4605_v48, %v884_v54 }
 0x1d9   : > { %959 = vadd.xlane.f32.xlu1 %v958_v59  ;;  %v4237_v61 = vpop.f32.mrb[4].mxu1  ;;  %v952_v62 = vsel %vm671_vm1, %v920_v58, 0.0  ;;  %v921_v63 = vmul.f32 %v4605_v48, %v882_v56 }
 0x1da   : > { %v779_v0 = vadd.f32 %v4237_v61, %v4598_v43  ;;  %v770_v1 = vpop.f32.mrb[5].mxu1  ;;  %953 = vadd.xlane.f32.xlu0 %v952_v62  ;;  %v961_v7 = vsel %vm671_vm1, %v923_v60, 0.0 }
 0x1db   : > { %v771_v2 = vadd.f32 %v4598_v43, %v770_v1  ;;  %v4238_v3 = vpop.f32.mrb[6].mxu1  ;;  %v955_v10 = vsel %vm671_vm1, %v921_v63, 0.0 }
 0x1dc   : > { %v887_v4 = vmax.f32 %v779_v0, 0.0  ;;  %v782_v5 = vadd.f32 %v4238_v3, %v4598_v43  ;;  %v773_v6 = vpop.f32.mrb[7].mxu1 }
 0x1dd   : > { %v885_v8 = vmax.f32 %v771_v2, 0.0  ;;  %v774_v9 = vadd.f32 %v4598_v43, %v773_v6  ;;  %962 = vadd.xlane.f32.xlu1 %v961_v7 }
 0x1de   : > { %v888_v11 = vmax.f32 %v782_v5, 0.0  ;;  %956 = vadd.xlane.f32.xlu0 %v955_v10  ;;  %v926_v12 = vmul.f32 %v4605_v48, %v887_v4 }
 0x1df   : > { %v886_v13 = vmax.f32 %v774_v9, 0.0  ;;  %v924_v17 = vmul.f32 %v4605_v48, %v885_v8 }
 0x1e0   : > { %v970_v14 = vsel %vm671_vm1, %v926_v12, 0.0  ;;  %v927_v15 = vmul.f32 %v4605_v48, %v888_v11 }
 0x1e1   : > { %v4241_v16 = vpop.f32.mrb[8].mxu1  ;;  %v925_v21 = vmul.f32 %v4605_v48, %v886_v13  ;;  %v964_v29 = vsel %vm671_vm1, %v924_v17, 0.0 }
 0x1e2   : > { %v795_v18 = vadd.f32 %v4241_v16, %v4598_v43  ;;  %v786_v19 = vpop.f32.mrb[9].mxu1  ;;  %971 = vadd.xlane.f32.xlu0 %v970_v14  ;;  %v973_v20 = vsel %vm671_vm1, %v927_v15, 0.0 }
 0x1e3   : > { %v787_v22 = vadd.f32 %v4598_v43, %v786_v19  ;;  %974 = vadd.xlane.f32.xlu1 %v973_v20  ;;  %v4242_v23 = vpop.f32.mrb[10].mxu1  ;;  %v967_v31 = vsel %vm671_vm1, %v925_v21, 0.0 }
 0x1e4   : > { %v891_v24 = vmax.f32 %v795_v18, 0.0  ;;  %v798_v25 = vadd.f32 %v4242_v23, %v4598_v43  ;;  %v789_v26 = vpop.f32.mrb[11].mxu1 }
 0x1e5   : > { %v889_v27 = vmax.f32 %v787_v22, 0.0  ;;  %v790_v28 = vadd.f32 %v4598_v43, %v789_v26 }
 0x1e6   : > { %v892_v30 = vmax.f32 %v798_v25, 0.0  ;;  %965 = vadd.xlane.f32.xlu0 %v964_v29  ;;  %v930_v32 = vmul.f32 %v4605_v48, %v891_v24 }
 0x1e7   : > { %v890_v33 = vmax.f32 %v790_v28, 0.0  ;;  %968 = vadd.xlane.f32.xlu1 %v967_v31  ;;  %v928_v37 = vmul.f32 %v4605_v48, %v889_v27 }
 0x1e8   : > { %v982_v34 = vsel %vm671_vm1, %v930_v32, 0.0  ;;  %v931_v35 = vmul.f32 %v4605_v48, %v892_v30 }
 0x1e9   : > { %v4245_v36 = vpop.f32.mrb[12].mxu1  ;;  %v929_v41 = vmul.f32 %v4605_v48, %v890_v33  ;;  %v976_v50 = vsel %vm671_vm1, %v928_v37, 0.0 }
 0x1ea   : > { %v811_v38 = vadd.f32 %v4245_v36, %v4598_v43  ;;  %v802_v39 = vpop.f32.mrb[13].mxu1  ;;  %983 = vadd.xlane.f32.xlu0 %v982_v34  ;;  %v985_v40 = vsel %vm671_vm1, %v931_v35, 0.0 }
 0x1eb   : > { %v803_v42 = vadd.f32 %v4598_v43, %v802_v39  ;;  %v4246_v44 = vpop.f32.mrb[14].mxu1  ;;  %986 = vadd.xlane.f32.xlu1 %v985_v40  ;;  %v979_v52 = vsel %vm671_vm1, %v929_v41, 0.0 }
 0x1ec   : > { %v895_v45 = vmax.f32 %v811_v38, 0.0  ;;  %v814_v46 = vadd.f32 %v4246_v44, %v4598_v43  ;;  %v805_v47 = vpop.f32.mrb[15].mxu1 }
 0x1ed   : > { %v893_v57 = vmax.f32 %v803_v42, 0.0  ;;  %v806_v49 = vadd.f32 %v4598_v43, %v805_v47 }
 0x1ee   : > { %v896_v51 = vmax.f32 %v814_v46, 0.0  ;;  %977 = vadd.xlane.f32.xlu0 %v976_v50  ;;  %v934_v53 = vmul.f32 %v4605_v48, %v895_v45 }
 0x1ef   : > { %v894_v54 = vmax.f32 %v806_v49, 0.0  ;;  %980 = vadd.xlane.f32.xlu1 %v979_v52  ;;  %v932_v59 = vmul.f32 %v4605_v48, %v893_v57 }
 0x1f0   : > { %v994_v55 = vsel %vm671_vm1, %v934_v53, 0.0  ;;  %v935_v56 = vmul.f32 %v4605_v48, %v896_v51 }
 0x1f1   : > { %v4249_v58 = vpop.f32.mrb[16].mxu1  ;;  %v933_v63 = vmul.f32 %v4605_v48, %v894_v54  ;;  %v988_v7 = vsel %vm671_vm1, %v932_v59, 0.0 }
 0x1f2   : > { %v827_v60 = vadd.f32 %v4249_v58, %v4598_v43  ;;  %v818_v61 = vpop.f32.mrb[17].mxu1  ;;  %995 = vadd.xlane.f32.xlu0 %v994_v55  ;;  %v997_v62 = vsel %vm671_vm1, %v935_v56, 0.0 }
 0x1f3   : > { %v819_v0 = vadd.f32 %v4598_v43, %v818_v61  ;;  %v4250_v1 = vpop.f32.mrb[18].mxu1  ;;  %998 = vadd.xlane.f32.xlu1 %v997_v62  ;;  %v991_v9 = vsel %vm671_vm1, %v933_v63, 0.0 }
 0x1f4   : > { %v899_v2 = vmax.f32 %v827_v60, 0.0  ;;  %v830_v3 = vadd.f32 %v4250_v1, %v4598_v43  ;;  %v821_v4 = vpop.f32.mrb[19].mxu1 }
 0x1f5   : > { %v897_v5 = vmax.f32 %v819_v0, 0.0  ;;  %v822_v6 = vadd.f32 %v4598_v43, %v821_v4 }
 0x1f6   : > { %v900_v8 = vmax.f32 %v830_v3, 0.0  ;;  %989 = vadd.xlane.f32.xlu0 %v988_v7  ;;  %v938_v10 = vmul.f32 %v4605_v48, %v899_v2 }
 0x1f7   : > { %v898_v11 = vmax.f32 %v822_v6, 0.0  ;;  %992 = vadd.xlane.f32.xlu1 %v991_v9  ;;  %v936_v15 = vmul.f32 %v4605_v48, %v897_v5 }
 0x1f8   : > { %v1006_v12 = vsel %vm671_vm1, %v938_v10, 0.0  ;;  %v939_v13 = vmul.f32 %v4605_v48, %v900_v8 }
 0x1f9   : > { %v4253_v14 = vpop.f32.mrb[20].mxu1  ;;  %v937_v19 = vmul.f32 %v4605_v48, %v898_v11  ;;  %v1000_v27 = vsel %vm671_vm1, %v936_v15, 0.0 }
 0x1fa   : > { %v843_v16 = vadd.f32 %v4253_v14, %v4598_v43  ;;  %v834_v17 = vpop.f32.mrb[21].mxu1  ;;  %1007 = vadd.xlane.f32.xlu0 %v1006_v12  ;;  %v1009_v18 = vsel %vm671_vm1, %v939_v13, 0.0 }
 0x1fb   : > { %v835_v20 = vadd.f32 %v4598_v43, %v834_v17  ;;  %v4254_v21 = vpop.f32.mrb[22].mxu1  ;;  %1010 = vadd.xlane.f32.xlu1 %v1009_v18  ;;  %v1003_v28 = vsel %vm671_vm1, %v937_v19, 0.0 }
 0x1fc   : > { %v903_v22 = vmax.f32 %v843_v16, 0.0  ;;  %v837_v23 = vpop.f32.mrb[23].mxu1  ;;  %v846_v25 = vadd.f32 %v4254_v21, %v4598_v43  ;;  %v1054_v16 = vlaneseq }
 0x1fd   : > { %v901_v24 = vmax.f32 %v835_v20, 0.0  ;;  %v838_v26 = vadd.f32 %v4598_v43, %v837_v23  ;;  %v1052_v20 = vpop.permute.xlu1 %1051 }
 0x1fe   : > { %1001 = vadd.xlane.f32.xlu0 %v1000_v27  ;;  %v942_v29 = vmul.f32 %v4605_v48, %v903_v22  ;;  %v904_v32 = vmax.f32 %v846_v25, 0.0  ;;  %v4702_v17 = vshrl.u32 %v1054_v16, 7 }
 0x1ff   : > { %v902_v30 = vmax.f32 %v838_v26, 0.0  ;;  %1004 = vadd.xlane.f32.xlu1 %v1003_v28  ;;  %v940_v35 = vmul.f32 %v4605_v48, %v901_v24 }
 0x200   : > { %v1018_v31 = vsel %vm671_vm1, %v942_v29, 0.0  ;;  %v943_v46 = vmul.f32 %v4605_v48, %v904_v32  ;;  %v4705_v19 = vsub.s32 0, %v4702_v17  ;;  %v4711_v23 = vsub.s32 1, %v4702_v17 }
 0x201   : > { %v4257_v33 = vpop.f32.mrb[24].mxu1  ;;  %v941_v34 = vmul.f32 %v4605_v48, %v902_v30  ;;  %v1012_v45 = vsel %vm671_vm1, %v940_v35, 0.0  ;;  %v4714_v24 = vsub.s32 2, %v4702_v17  ;;  %v4717_v25 = vsub.s32 3, %v4702_v17 }
 0x202   : > { %v859_v36 = vadd.f32 %v4257_v33, %v4598_v43  ;;  %v850_v37 = vpop.f32.mrb[25].mxu1  ;;  %1019 = vadd.xlane.f32.xlu0 %v1018_v31  ;;  %v1021_v52 = vsel %vm671_vm1, %v943_v46, 0.0  ;;  %v4708_v22 = vrot.slane %v1052_v20, %v4705_v19  ;;  %v4720_v27 = vsub.s32 4, %v4702_v17 }
 0x203   : > { %v4258_v38 = vpop.f32.mrb[26].mxu1  ;;  %v1015_v39 = vsel %vm671_vm1, %v941_v34, 0.0  ;;  %v851_v44 = vadd.f32 %v4598_v43, %v850_v37  ;;  %v4723_v28 = vsub.s32 5, %v4702_v17  ;;  %v4726_v29 = vsub.s32 6, %v4702_v17 }
 0x204   : > { %v907_v40 = vmax.f32 %v859_v36, 0.0  ;;  %v862_v41 = vadd.f32 %v4258_v38, %v4598_v43  ;;  %1016 = vadd.xlane.f32.xlu1 %v1015_v39  ;;  %v853_v42 = vpop.f32.mrb[27].mxu1  ;;  %v4729_v30 = vsub.s32 7, %v4702_v17 }
 0x205   : > { %v905_v50 = vmax.f32 %v851_v44, 0.0  ;;  %v854_v51 = vadd.f32 %v4598_v43, %v853_v42 }
 0x206   : > { %v908_v47 = vmax.f32 %v862_v41, 0.0  ;;  %1013 = vadd.xlane.f32.xlu0 %v1012_v45  ;;  %v946_v57 = vmul.f32 %v4605_v48, %v907_v40 }
 0x207   : > { %v906_v0 = vmax.f32 %v854_v51, 0.0  ;;  %v944_v1 = vmul.f32 %v4605_v48, %v905_v50 }
 0x208   : > { %v947_v49 = vmul.f32 %v4605_v48, %v908_v47  ;;  %v1030_v58 = vsel %vm671_vm1, %v946_v57, 0.0 }
 0x209   : > { %v4261_v53 = vpop.f32.mrb[28].mxu1  ;;  %v1024_v9 = vsel %vm671_vm1, %v944_v1, 0.0  ;;  %v945_v10 = vmul.f32 %v4605_v48, %v906_v0 }
 0x20a   : > { %1022 = vadd.xlane.f32.xlu0 %v1021_v52  ;;  %v1033_v54 = vsel %vm671_vm1, %v947_v49, 0.0  ;;  %v875_v55 = vadd.f32 %v4261_v53, %v4598_v43  ;;  %v866_v56 = vpop.f32.mrb[29].mxu1 }
 0x20b   : > { %1034 = vadd.xlane.f32.xlu1 %v1033_v54  ;;  %v867_v59 = vadd.f32 %v4598_v43, %v866_v56  ;;  %v4262_v60 = vpop.f32.mrb[30].mxu1  ;;  %v1027_v12 = vsel %vm671_vm1, %v945_v10, 0.0 }
 0x20c   : > { %v911_v61 = vmax.f32 %v875_v55, 0.0  ;;  %v878_v62 = vadd.f32 %v4262_v60, %v4598_v43  ;;  %v869_v63 = vpop.f32.mrb[31].mxu1 }
 0x20d   : > { %v909_v2 = vmax.f32 %v867_v59, 0.0  ;;  %v870_v3 = vadd.f32 %v4598_v43, %v869_v63 }
 0x20e   : > { %1031 = vadd.xlane.f32.xlu0 %v1030_v58  ;;  %v912_v4 = vmax.f32 %v878_v62, 0.0  ;;  %v950_v5 = vmul.f32 %v4605_v48, %v911_v61 }
 0x20f   : > { %v910_v6 = vmax.f32 %v870_v3, 0.0  ;;  %v948_v7 = vmul.f32 %v4605_v48, %v909_v2 }
 0x210   : > { %v951_v8 = vmul.f32 %v4605_v48, %v912_v4  ;;  %v1042_v43 = vsel %vm671_vm1, %v950_v5, 0.0 }
 0x211   : > { %v949_v11 = vmul.f32 %v4605_v48, %v910_v6  ;;  %v1036_v13 = vsel %vm671_vm1, %v948_v7, 0.0  ;;  %v4377_v48 = vmov 1966171168  }
 0x212   : > { %1025 = vadd.xlane.f32.xlu0 %v1024_v9  ;;  %v1045_v15 = vsel %vm671_vm1, %v951_v8, 0.0  ;;  %v2151_v18 = vunpack.c.l.s4 %v4377_v48 }
 0x213   : > { %v1039_v14 = vsel %vm671_vm1, %v949_v11, 0.0  ;;  %vm4018_vm1 = vcmp.lt.s32.totalorder %v1054_v16, 256 }
 0x214   : > { %v2152_v21 = vunpack.c.0.s8 %v2151_v18 }
 0x216   : > { %1028 = vadd.xlane.f32.xlu0 %v1027_v12  ;;  %v4734_v34 = vsub.s32 %v2152_v21, %v4702_v17 }
 0x21a   : > { %1043 = vadd.xlane.f32.xlu0 %v1042_v43 }
 0x21e   : > { %1037 = vadd.xlane.f32.xlu0 %v1036_v13 }
 0x222   : > { %1040 = vadd.xlane.f32.xlu0 %v1039_v14 }
 0x226   : > { %1046 = vadd.xlane.f32.xlu0 %v1045_v15 }
 0x266   : > { %v960_v26 = vpop.xlane.xlu1 %959 }
 0x267   : > { %v1060_v31 = vadd.f32 %v4708_v22, %v960_v26  ;;  %v954_v32 = vpop.xlane.xlu0 %953 }
 0x268   : > { %v1058_v33 = vadd.f32 %v4708_v22, %v954_v32 }
 0x269   : > { %v1189_v35 = vrot.slane %v1060_v31, %v4705_v19  ;;  %v1193_v36 = vrot.slane %v1060_v31, %v4711_v23  ;;  %v1197_v37 = vrot.slane %v1060_v31, %v4714_v24  ;;  %v1201_v38 = vrot.slane %v1060_v31, %v4717_v25 }
 0x26a   : > { %v963_v39 = vpop.xlane.xlu1 %962  ;;  %v1205_v40 = vrot.slane %v1060_v31, %v4720_v27  ;;  %v1209_v41 = vrot.slane %v1060_v31, %v4723_v28  ;;  %v1213_v42 = vrot.slane %v1060_v31, %v4726_v29  ;;  %v1217_v44 = vrot.slane %v1060_v31, %v4729_v30 }
 0x26b   : > { %v1061_v45 = vadd.f32 %v4708_v22, %v963_v39  ;;  %v957_v46 = vpop.xlane.xlu0 %956  ;;  %v2244_v47 = vcombine.low %v1189_v35, %v1193_v36  ;;  %v2245_v57 = vcombine.low %v1197_v37, %v1201_v38  ;;  %v1125_v49 = vrot.slane %v1058_v33, %v4705_v19 }
 0x26c   : > { %v4747_v50 = vadd.f32 %v4708_v22, %v957_v46  ;;  %v2246_v51 = vcombine.low %v1205_v40, %v1209_v41  ;;  %v2247_v52 = vcombine.low %v1213_v42, %v1217_v44  ;;  %v1129_v53 = vrot.slane %v1058_v33, %v4711_v23 }
 0x26d   : > { %v2254_v54 = vrot.slane %v2244_v47, %v4734_v34  ;;  %v2261_v55 = vrot.slane %v2245_v57, %v4734_v34  ;;  %v1133_v56 = vrot.slane %v1058_v33, %v4714_v24  ;;  %v1137_v58 = vrot.slane %v1058_v33, %v4717_v25 }
 0x26e   : > { %v2268_v59 = vrot.slane %v2246_v51, %v4734_v34  ;;  %v2275_v60 = vrot.slane %v2247_v52, %v4734_v34  ;;  %v1141_v61 = vrot.slane %v1058_v33, %v4720_v27  ;;  %v1145_v62 = vrot.slane %v1058_v33, %v4723_v28 }
 0x26f   : > { %v972_v63 = vpop.xlane.xlu0 %971  ;;  %v2276_v0 = vcombine.low %v2254_v54, %v2261_v55  ;;  %v1149_v1 = vrot.slane %v1058_v33, %v4726_v29  ;;  %v1153_v2 = vrot.slane %v1058_v33, %v4729_v30  ;;  %v2146_v3 = vcombine.low %v1125_v49, %v1129_v53 }
 0x270   : > { %v4761_v4 = vadd.f32 %v4708_v22, %v972_v63  ;;  %v975_v5 = vpop.xlane.xlu1 %974  ;;  %v2277_v6 = vcombine.low %v2268_v59, %v2275_v60  ;;  %v2147_v7 = vcombine.low %v1133_v56, %v1137_v58  ;;  %v2148_v8 = vcombine.low %v1141_v61, %v1145_v62 }
 0x271   : > { %v4764_v9 = vadd.f32 %v4708_v22, %v975_v5  ;;  %v2284_v10 = vrot.slane %v2276_v0, %v4734_v34  ;;  %v2149_v11 = vcombine.low %v1149_v1, %v1153_v2  ;;  %v2156_v12 = vrot.slane %v2146_v3, %v4734_v34 }
 0x272   : > { %v2291_v43 = vrot.slane %v2277_v6, %v4734_v34  ;;  %v2163_v13 = vrot.slane %v2147_v7, %v4734_v34  ;;  %v2170_v14 = vrot.slane %v2148_v8, %v4734_v34  ;;  %v1221_v15 = vrot.slane %v1061_v45, %v4705_v19 }
 0x273   : > { %v966_v48 = vpop.xlane.xlu0 %965  ;;  %v2177_v18 = vrot.slane %v2149_v11, %v4734_v34  ;;  %v1225_v20 = vrot.slane %v1061_v45, %v4711_v23  ;;  %v1229_v21 = vrot.slane %v1061_v45, %v4714_v24  ;;  %v1233_v26 = vrot.slane %v1061_v45, %v4717_v25 }
 0x274   : > { %v4777_v31 = vadd.f32 %v4708_v22, %v966_v48  ;;  %v969_v32 = vpop.xlane.xlu1 %968  ;;  %v2292_v33 = vcombine.low %v2284_v10, %v2291_v43  ;;  %v2178_v35 = vcombine.low %v2156_v12, %v2163_v13  ;;  %v1237_v36 = vrot.slane %v1061_v45, %v4720_v27 }
 0x275   : > { %v4781_v37 = vadd.f32 %v4708_v22, %v969_v32  ;;  %v2179_v38 = vcombine.low %v2170_v14, %v2177_v18  ;;  %v1241_v39 = vrot.slane %v1061_v45, %v4723_v28  ;;  %v1245_v40 = vrot.slane %v1061_v45, %v4726_v29 }
 0x276   : > { %3721 = vperm.xlu1 %4304, %v2292_v33   ;;  %v2186_v41 = vrot.slane %v2178_v35, %v4734_v34  ;;  %v1249_v42 = vrot.slane %v1061_v45, %v4729_v30  ;;  %v2293_v44 = vcombine.low %v1221_v15, %v1225_v20  ;;  %v2294_v46 = vcombine.low %v1229_v21, %v1233_v26 }
 0x277   : > { %v2193_v47 = vrot.slane %v2179_v38, %v4734_v34  ;;  %v984_v57 = vpop.xlane.xlu0 %983  ;;  %v2295_v49 = vcombine.low %v1237_v36, %v1241_v39  ;;  %v1157_v51 = vrot.slane %v4747_v50, %v4705_v19  ;;  %v1161_v52 = vrot.slane %v4747_v50, %v4711_v23 }
 0x278   : > { %v4793_v53 = vadd.f32 %v4708_v22, %v984_v57  ;;  %v987_v54 = vpop.xlane.xlu1 %986  ;;  %v2296_v55 = vcombine.low %v1245_v40, %v1249_v42  ;;  %v2303_v56 = vrot.slane %v2293_v44, %v4734_v34  ;;  %v2310_v45 = vrot.slane %v2294_v46, %v4734_v34 }
 0x279   : > { %v2194_v58 = vcombine.low %v2186_v41, %v2193_v47  ;;  %v4798_v59 = vadd.f32 %v4708_v22, %v987_v54  ;;  %v2317_v60 = vrot.slane %v2295_v49, %v4734_v34  ;;  %v1165_v61 = vrot.slane %v4747_v50, %v4714_v24 }
 0x27a   : > { %v2324_v62 = vrot.slane %v2296_v55, %v4734_v34  ;;  %v2325_v63 = vcombine.low %v2303_v56, %v2310_v45  ;;  %v1169_v0 = vrot.slane %v4747_v50, %v4717_v25  ;;  %v1173_v1 = vrot.slane %v4747_v50, %v4720_v27 }
 0x27b   : > { %3715 = vperm.xlu0 %4305, %v2194_v58   ;;  %v978_v2 = vpop.xlane.xlu0 %977  ;;  %v1177_v3 = vrot.slane %v4747_v50, %v4723_v28  ;;  %v1181_v5 = vrot.slane %v4747_v50, %v4726_v29  ;;  %v1185_v6 = vrot.slane %v4747_v50, %v4729_v30  ;;  %v2195_v7 = vcombine.low %v1157_v51, %v1161_v52 }
 0x27c   : > { %v2326_v8 = vcombine.low %v2317_v60, %v2324_v62  ;;  %v2333_v10 = vrot.slane %v2325_v63, %v4734_v34  ;;  %v4816_v11 = vadd.f32 %v4708_v22, %v978_v2  ;;  %v981_v12 = vpop.xlane.xlu1 %980  ;;  %v2196_v43 = vcombine.low %v1165_v61, %v1169_v0 }
 0x27d   : > { %v4819_v13 = vadd.f32 %v4708_v22, %v981_v12  ;;  %v2197_v14 = vcombine.low %v1173_v1, %v1177_v3  ;;  %v2198_v15 = vcombine.low %v1181_v5, %v1185_v6  ;;  %v2205_v48 = vrot.slane %v2195_v7, %v4734_v34 }
 0x27e   : > { %v2340_v18 = vrot.slane %v2326_v8, %v4734_v34  ;;  %v2212_v50 = vrot.slane %v2196_v43, %v4734_v34  ;;  %v1317_v20 = vrot.slane %v4761_v4, %v4705_v19  ;;  %v1321_v21 = vrot.slane %v4761_v4, %v4711_v23 }
 0x27f   : > { %v2219_v26 = vrot.slane %v2197_v14, %v4734_v34  ;;  %v2226_v32 = vrot.slane %v2198_v15, %v4734_v34  ;;  %v996_v33 = vpop.xlane.xlu0 %995  ;;  %v1325_v35 = vrot.slane %v4761_v4, %v4714_v24  ;;  %v1329_v36 = vrot.slane %v4761_v4, %v4717_v25 }
 0x280   : > { %v2341_v38 = vcombine.low %v2333_v10, %v2340_v18  ;;  %v2227_v39 = vcombine.low %v2205_v48, %v2212_v50  ;;  %v4835_v40 = vadd.f32 %v4708_v22, %v996_v33  ;;  %v999_v41 = vpop.xlane.xlu1 %998  ;;  %v1333_v42 = vrot.slane %v4761_v4, %v4720_v27 }
 0x281   : > { %v2228_v44 = vcombine.low %v2219_v26, %v2226_v32  ;;  %v4840_v46 = vadd.f32 %v4708_v22, %v999_v41  ;;  %v1337_v47 = vrot.slane %v4761_v4, %v4723_v28  ;;  %v1341_v57 = vrot.slane %v4761_v4, %v4726_v29 }
 0x282   : > { %3724 = vperm.xlu1 %4304, %v2341_v38   ;;  %v2235_v49 = vrot.slane %v2227_v39, %v4734_v34  ;;  %v1345_v51 = vrot.slane %v4761_v4, %v4729_v30  ;;  %v2440_v52 = vcombine.low %v1317_v20, %v1321_v21  ;;  %v2441_v54 = vcombine.low %v1325_v35, %v1329_v36 }
 0x283   : > { %v2242_v55 = vrot.slane %v2228_v44, %v4734_v34  ;;  %v2442_v56 = vcombine.low %v1333_v42, %v1337_v47  ;;  %v990_v45 = vpop.xlane.xlu0 %989  ;;  %v1253_v58 = vrot.slane %v4777_v31, %v4705_v19  ;;  %v1257_v60 = vrot.slane %v4777_v31, %v4711_v23 }
 0x284   : > { %v2443_v61 = vcombine.low %v1341_v57, %v1345_v51  ;;  %v2450_v62 = vrot.slane %v2440_v52, %v4734_v34  ;;  %v2457_v63 = vrot.slane %v2441_v54, %v4734_v34  ;;  %v4857_v0 = vadd.f32 %v4708_v22, %v990_v45  ;;  %v993_v4 = vpop.xlane.xlu1 %992 }
 0x285   : > { %v2243_v1 = vcombine.low %v2235_v49, %v2242_v55  ;;  %v2464_v2 = vrot.slane %v2442_v56, %v4734_v34  ;;  %v4861_v3 = vadd.f32 %v4708_v22, %v993_v4  ;;  %v1261_v5 = vrot.slane %v4777_v31, %v4714_v24 }
 0x286   : > { %v2471_v6 = vrot.slane %v2443_v61, %v4734_v34  ;;  %v2472_v7 = vcombine.low %v2450_v62, %v2457_v63  ;;  %v1265_v8 = vrot.slane %v4777_v31, %v4717_v25  ;;  %v1269_v10 = vrot.slane %v4777_v31, %v4720_v27 }
 0x287   : > { %3718 = vperm.xlu1 %4304, %v2243_v1   ;;  %v1273_v12 = vrot.slane %v4777_v31, %v4723_v28  ;;  %v1277_v43 = vrot.slane %v4777_v31, %v4726_v29  ;;  %v1281_v14 = vrot.slane %v4777_v31, %v4729_v30  ;;  %v2342_v15 = vcombine.low %v1253_v58, %v1257_v60  ;;  %v1008_v48 = vpop.xlane.xlu0 %1007 }
 0x288   : > { %v2473_v18 = vcombine.low %v2464_v2, %v2471_v6  ;;  %v2480_v50 = vrot.slane %v2472_v7, %v4734_v34  ;;  %v2343_v20 = vcombine.low %v1261_v5, %v1265_v8  ;;  %v4878_v21 = vadd.f32 %v4708_v22, %v1008_v48  ;;  %v1011_v26 = vpop.xlane.xlu1 %1010 }
 0x289   : > { %v2344_v32 = vcombine.low %v1269_v10, %v1273_v12  ;;  %v2345_v33 = vcombine.low %v1277_v43, %v1281_v14  ;;  %v2352_v35 = vrot.slane %v2342_v15, %v4734_v34  ;;  %v4882_v36 = vadd.f32 %v4708_v22, %v1011_v26 }
 0x28a   : > { %v2487_v38 = vrot.slane %v2473_v18, %v4734_v34  ;;  %v2359_v31 = vrot.slane %v2343_v20, %v4734_v34  ;;  %v1349_v39 = vrot.slane %v4764_v9, %v4705_v19  ;;  %v1353_v41 = vrot.slane %v4764_v9, %v4711_v23 }
 0x28b   : > { %v2366_v42 = vrot.slane %v2344_v32, %v4734_v34  ;;  %v2373_v44 = vrot.slane %v2345_v33, %v4734_v34  ;;  %v1357_v47 = vrot.slane %v4764_v9, %v4714_v24  ;;  %v1361_v57 = vrot.slane %v4764_v9, %v4717_v25  ;;  %v1002_v49 = vpop.xlane.xlu0 %1001 }
 0x28c   : > { %v2488_v51 = vcombine.low %v2480_v50, %v2487_v38  ;;  %v2374_v52 = vcombine.low %v2352_v35, %v2359_v31  ;;  %v1365_v54 = vrot.slane %v4764_v9, %v4720_v27  ;;  %v1369_v55 = vrot.slane %v4764_v9, %v4723_v28  ;;  %v1005_v56 = vpop.xlane.xlu1 %1004 }
 0x28d   : > { %v2375_v45 = vcombine.low %v2366_v42, %v2373_v44  ;;  %v1373_v58 = vrot.slane %v4764_v9, %v4726_v29  ;;  %v1377_v60 = vrot.slane %v4764_v9, %v4729_v30  ;;  %v2489_v61 = vcombine.low %v1349_v39, %v1353_v41 }
 0x28e   : > { %3733 = vperm.xlu1 %4304, %v2488_v51   ;;  %v2382_v62 = vrot.slane %v2374_v52, %v4734_v34  ;;  %v2490_v63 = vcombine.low %v1357_v47, %v1361_v57  ;;  %v2491_v4 = vcombine.low %v1365_v54, %v1369_v55  ;;  %v4906_v1 = vadd.f32 %v4708_v22, %v1002_v49 }
 0x28f   : > { %v2389_v2 = vrot.slane %v2375_v45, %v4734_v34  ;;  %v2492_v5 = vcombine.low %v1373_v58, %v1377_v60  ;;  %v2499_v6 = vrot.slane %v2489_v61, %v4734_v34  ;;  %v4911_v7 = vadd.f32 %v4708_v22, %v1005_v56  ;;  %v1020_v18 = vpop.xlane.xlu0 %1019 }
 0x290   : > { %v2506_v8 = vrot.slane %v2490_v63, %v4734_v34  ;;  %v2513_v9 = vrot.slane %v2491_v4, %v4734_v34  ;;  %v1285_v10 = vrot.slane %v4781_v37, %v4705_v19  ;;  %v1289_v12 = vrot.slane %v4781_v37, %v4711_v23 }
 0x291   : > { %v2390_v43 = vcombine.low %v2382_v62, %v2389_v2  ;;  %v2520_v14 = vrot.slane %v2492_v5, %v4734_v34  ;;  %v1293_v15 = vrot.slane %v4781_v37, %v4714_v24  ;;  %v1297_v48 = vrot.slane %v4781_v37, %v4717_v25  ;;  %v1017_v50 = vpop.xlane.xlu1 %1016 }
 0x292   : > { %v2521_v20 = vcombine.low %v2499_v6, %v2506_v8  ;;  %v1301_v26 = vrot.slane %v4781_v37, %v4720_v27  ;;  %v1305_v32 = vrot.slane %v4781_v37, %v4723_v28  ;;  %v1309_v33 = vrot.slane %v4781_v37, %v4726_v29 }
 0x293   : > { %3727 = vperm.xlu1 %4304, %v2390_v43   ;;  %v2522_v35 = vcombine.low %v2513_v9, %v2520_v14  ;;  %v1313_v38 = vrot.slane %v4781_v37, %v4729_v30  ;;  %v2391_v31 = vcombine.low %v1285_v10, %v1289_v12  ;;  %v2392_v39 = vcombine.low %v1293_v15, %v1297_v48  ;;  %v1014_v62 = vpop.xlane.xlu0 %1013 }
 0x294   : > { %v2529_v41 = vrot.slane %v2521_v20, %v4734_v34  ;;  %v2393_v42 = vcombine.low %v1301_v26, %v1305_v32  ;;  %v4934_v44 = vadd.f32 %v4708_v22, %v1020_v18  ;;  %v4937_v47 = vadd.f32 %v4708_v22, %v1017_v50 }
 0x295   : > { %v2536_v57 = vrot.slane %v2522_v35, %v4734_v34  ;;  %v2394_v49 = vcombine.low %v1309_v33, %v1313_v38  ;;  %v2401_v51 = vrot.slane %v2391_v31, %v4734_v34  ;;  %v2408_v52 = vrot.slane %v2392_v39, %v4734_v34 }
 0x296   : > { %v2415_v37 = vrot.slane %v2393_v42, %v4734_v34  ;;  %v1445_v54 = vrot.slane %v4793_v53, %v4705_v19  ;;  %v1449_v55 = vrot.slane %v4793_v53, %v4711_v23  ;;  %v1453_v56 = vrot.slane %v4793_v53, %v4714_v24 }
 0x297   : > { %v2537_v45 = vcombine.low %v2529_v41, %v2536_v57  ;;  %v2422_v58 = vrot.slane %v2394_v49, %v4734_v34  ;;  %v2423_v60 = vcombine.low %v2401_v51, %v2408_v52  ;;  %v1457_v61 = vrot.slane %v4793_v53, %v4717_v25 }
 0x298   : > { %v1461_v63 = vrot.slane %v4793_v53, %v4720_v27  ;;  %v1465_v4 = vrot.slane %v4793_v53, %v4723_v28  ;;  %v1469_v2 = vrot.slane %v4793_v53, %v4726_v29  ;;  %v1473_v5 = vrot.slane %v4793_v53, %v4729_v30 }
 0x299   : > { %3736 = vperm.xlu1 %4304, %v2537_v45   ;;  %v2424_v6 = vcombine.low %v2415_v37, %v2422_v58  ;;  %v2431_v8 = vrot.slane %v2423_v60, %v4734_v34  ;;  %v2636_v9 = vcombine.low %v1445_v54, %v1449_v55  ;;  %v2637_v10 = vcombine.low %v1453_v56, %v1457_v61 }
 0x29a   : > { %v2638_v12 = vcombine.low %v1461_v63, %v1465_v4  ;;  %v2639_v43 = vcombine.low %v1469_v2, %v1473_v5  ;;  %v4962_v14 = vadd.f32 %v4708_v22, %v1014_v62  ;;  %v1381_v15 = vrot.slane %v4816_v11, %v4705_v19  ;;  %v1023_v63 = vpop.xlane.xlu0 %1022 }
 0x29b   : > { %v2438_v48 = vrot.slane %v2424_v6, %v4734_v34  ;;  %v2646_v18 = vrot.slane %v2636_v9, %v4734_v34  ;;  %v2653_v53 = vrot.slane %v2637_v10, %v4734_v34  ;;  %v1385_v50 = vrot.slane %v4816_v11, %v4711_v23 }
 0x29c   : > { %v2660_v20 = vrot.slane %v2638_v12, %v4734_v34  ;;  %v2667_v26 = vrot.slane %v2639_v43, %v4734_v34  ;;  %v1389_v32 = vrot.slane %v4816_v11, %v4714_v24  ;;  %v1393_v33 = vrot.slane %v4816_v11, %v4717_v25 }
 0x29d   : > { %v2439_v35 = vcombine.low %v2431_v8, %v2438_v48  ;;  %v2668_v38 = vcombine.low %v2646_v18, %v2653_v53  ;;  %v1397_v31 = vrot.slane %v4816_v11, %v4720_v27  ;;  %v1401_v39 = vrot.slane %v4816_v11, %v4723_v28  ;;  %v1035_v8 = vpop.xlane.xlu1 %1034 }
 0x29e   : > { %v2669_v41 = vcombine.low %v2660_v20, %v2667_v26  ;;  %v1405_v42 = vrot.slane %v4816_v11, %v4726_v29  ;;  %v1409_v57 = vrot.slane %v4816_v11, %v4729_v30  ;;  %v2538_v49 = vcombine.low %v1381_v15, %v1385_v50 }
 0x29f   : > { %3730 = vperm.xlu1 %4304, %v2439_v35   ;;  %v2676_v51 = vrot.slane %v2668_v38, %v4734_v34  ;;  %v2539_v52 = vcombine.low %v1389_v32, %v1393_v33  ;;  %v2540_v37 = vcombine.low %v1397_v31, %v1401_v39  ;;  %v1701_v54 = vrot.slane %v4878_v21, %v4705_v19 }
 0x2a0   : > { %v2683_v55 = vrot.slane %v2669_v41, %v4734_v34  ;;  %v2541_v56 = vcombine.low %v1405_v42, %v1409_v57  ;;  %v2548_v45 = vrot.slane %v2538_v49, %v4734_v34  ;;  %v1705_v58 = vrot.slane %v4878_v21, %v4711_v23 }
 0x2a1   : > { %v2555_v60 = vrot.slane %v2539_v52, %v4734_v34  ;;  %v2562_v11 = vrot.slane %v2540_v37, %v4734_v34  ;;  %v1709_v61 = vrot.slane %v4878_v21, %v4714_v24  ;;  %v1713_v62 = vrot.slane %v4878_v21, %v4717_v25 }
 0x2a2   : > { %v2684_v4 = vcombine.low %v2676_v51, %v2683_v55  ;;  %v2569_v2 = vrot.slane %v2541_v56, %v4734_v34  ;;  %v1717_v5 = vrot.slane %v4878_v21, %v4720_v27  ;;  %v1721_v6 = vrot.slane %v4878_v21, %v4723_v28 }
 0x2a3   : > { %v2570_v9 = vcombine.low %v2548_v45, %v2555_v60  ;;  %v1725_v10 = vrot.slane %v4878_v21, %v4726_v29  ;;  %v1729_v12 = vrot.slane %v4878_v21, %v4729_v30  ;;  %v3028_v43 = vcombine.low %v1701_v54, %v1705_v58 }
 0x2a4   : > { %3745 = vperm.xlu1 %4304, %v2684_v4   ;;  %v2571_v15 = vcombine.low %v2562_v11, %v2569_v2  ;;  %v3029_v48 = vcombine.low %v1709_v61, %v1713_v62  ;;  %v3030_v18 = vcombine.low %v1717_v5, %v1721_v6  ;;  %v5008_v53 = vadd.f32 %v4708_v22, %v1023_v63 }
 0x2a5   : > { %v2578_v50 = vrot.slane %v2570_v9, %v4734_v34  ;;  %v3031_v20 = vcombine.low %v1725_v10, %v1729_v12  ;;  %v3038_v26 = vrot.slane %v3028_v43, %v4734_v34  ;;  %v5013_v32 = vadd.f32 %v4708_v22, %v1035_v8  ;;  %v1032_v8 = vpop.xlane.xlu0 %1031 }
 0x2a6   : > { %v2585_v33 = vrot.slane %v2571_v15, %v4734_v34  ;;  %v3045_v21 = vrot.slane %v3029_v48, %v4734_v34  ;;  %v3052_v35 = vrot.slane %v3030_v18, %v4734_v34  ;;  %v1477_v38 = vrot.slane %v4798_v59, %v4705_v19 }
 0x2a7   : > { %v3059_v31 = vrot.slane %v3031_v20, %v4734_v34  ;;  %v1481_v39 = vrot.slane %v4798_v59, %v4711_v23  ;;  %v1485_v41 = vrot.slane %v4798_v59, %v4714_v24  ;;  %v1489_v42 = vrot.slane %v4798_v59, %v4717_v25 }
 0x2a8   : > { %v2586_v57 = vcombine.low %v2578_v50, %v2585_v33  ;;  %v3060_v49 = vcombine.low %v3038_v26, %v3045_v21  ;;  %v1493_v51 = vrot.slane %v4798_v59, %v4720_v27  ;;  %v1497_v52 = vrot.slane %v4798_v59, %v4723_v28 }
 0x2a9   : > { %v3061_v37 = vcombine.low %v3052_v35, %v3059_v31  ;;  %v1501_v54 = vrot.slane %v4798_v59, %v4726_v29  ;;  %v1505_v55 = vrot.slane %v4798_v59, %v4729_v30  ;;  %v2685_v56 = vcombine.low %v1477_v38, %v1481_v39 }
 0x2aa   : > { %3739 = vperm.xlu1 %4304, %v2586_v57   ;;  %v3068_v45 = vrot.slane %v3060_v49, %v4734_v34  ;;  %v2686_v58 = vcombine.low %v1485_v41, %v1489_v42  ;;  %v2687_v60 = vcombine.low %v1493_v51, %v1497_v52  ;;  %v1733_v11 = vrot.slane %v4882_v36, %v4705_v19 }
 0x2ab   : > { %v3075_v61 = vrot.slane %v3061_v37, %v4734_v34  ;;  %v2688_v62 = vcombine.low %v1501_v54, %v1505_v55  ;;  %v2695_v63 = vrot.slane %v2685_v56, %v4734_v34  ;;  %v1737_v4 = vrot.slane %v4882_v36, %v4711_v23 }
 0x2ac   : > { %v2702_v2 = vrot.slane %v2686_v58, %v4734_v34  ;;  %v2709_v59 = vrot.slane %v2687_v60, %v4734_v34  ;;  %v1741_v5 = vrot.slane %v4882_v36, %v4714_v24  ;;  %v1745_v6 = vrot.slane %v4882_v36, %v4717_v25 }
 0x2ad   : > { %v3076_v9 = vcombine.low %v3068_v45, %v3075_v61  ;;  %v2716_v10 = vrot.slane %v2688_v62, %v4734_v34  ;;  %v1749_v12 = vrot.slane %v4882_v36, %v4720_v27  ;;  %v1753_v43 = vrot.slane %v4882_v36, %v4723_v28 }
 0x2ae   : > { %v2717_v15 = vcombine.low %v2695_v63, %v2702_v2  ;;  %v1757_v48 = vrot.slane %v4882_v36, %v4726_v29  ;;  %v1761_v18 = vrot.slane %v4882_v36, %v4729_v30  ;;  %v3077_v50 = vcombine.low %v1733_v11, %v1737_v4 }
 0x2af   : > { %3769 = vperm.xlu0 %4305, %v3076_v9   ;;  %v2718_v20 = vcombine.low %v2709_v59, %v2716_v10  ;;  %v3078_v26 = vcombine.low %v1741_v5, %v1745_v6  ;;  %v3079_v33 = vcombine.low %v1749_v12, %v1753_v43  ;;  %v5058_v21 = vadd.f32 %v4708_v22, %v1032_v8  ;;  %v1026_v43 = vpop.xlane.xlu0 %1025 }
 0x2b0   : > { %v2725_v35 = vrot.slane %v2717_v15, %v4734_v34  ;;  %v3080_v38 = vcombine.low %v1757_v48, %v1761_v18  ;;  %v3087_v31 = vrot.slane %v3077_v50, %v4734_v34  ;;  %v1413_v39 = vrot.slane %v4819_v13, %v4705_v19 }
 0x2b1   : > { %v2732_v41 = vrot.slane %v2718_v20, %v4734_v34  ;;  %v3094_v36 = vrot.slane %v3078_v26, %v4734_v34  ;;  %v3101_v42 = vrot.slane %v3079_v33, %v4734_v34  ;;  %v1417_v57 = vrot.slane %v4819_v13, %v4711_v23 }
 0x2b2   : > { %v3108_v49 = vrot.slane %v3080_v38, %v4734_v34  ;;  %v1421_v51 = vrot.slane %v4819_v13, %v4714_v24  ;;  %v1425_v52 = vrot.slane %v4819_v13, %v4717_v25  ;;  %v1429_v37 = vrot.slane %v4819_v13, %v4720_v27 }
 0x2b3   : > { %v2733_v54 = vcombine.low %v2725_v35, %v2732_v41  ;;  %v3109_v55 = vcombine.low %v3087_v31, %v3094_v36  ;;  %v1433_v56 = vrot.slane %v4819_v13, %v4723_v28  ;;  %v1437_v45 = vrot.slane %v4819_v13, %v4726_v29 }
 0x2b4   : > { %v3110_v58 = vcombine.low %v3101_v42, %v3108_v49  ;;  %v1441_v60 = vrot.slane %v4819_v13, %v4729_v30  ;;  %v2587_v11 = vcombine.low %v1413_v39, %v1417_v57  ;;  %v2588_v61 = vcombine.low %v1421_v51, %v1425_v52 }
 0x2b5   : > { %3748 = vperm.xlu1 %4304, %v2733_v54   ;;  %v3117_v62 = vrot.slane %v3109_v55, %v4734_v34  ;;  %v2589_v63 = vcombine.low %v1429_v37, %v1433_v56  ;;  %v1829_v4 = vrot.slane %v4934_v44, %v4705_v19  ;;  %v1833_v2 = vrot.slane %v4934_v44, %v4711_v23 }
 0x2b6   : > { %v3124_v59 = vrot.slane %v3110_v58, %v4734_v34  ;;  %v2590_v5 = vcombine.low %v1437_v45, %v1441_v60  ;;  %v2597_v6 = vrot.slane %v2587_v11, %v4734_v34  ;;  %v2604_v8 = vrot.slane %v2588_v61, %v4734_v34 }
 0x2b7   : > { %v2611_v13 = vrot.slane %v2589_v63, %v4734_v34  ;;  %v1837_v9 = vrot.slane %v4934_v44, %v4714_v24  ;;  %v1841_v10 = vrot.slane %v4934_v44, %v4717_v25  ;;  %v1845_v12 = vrot.slane %v4934_v44, %v4720_v27 }
 0x2b8   : > { %v3125_v15 = vcombine.low %v3117_v62, %v3124_v59  ;;  %v2618_v48 = vrot.slane %v2590_v5, %v4734_v34  ;;  %v2619_v18 = vcombine.low %v2597_v6, %v2604_v8  ;;  %v1849_v50 = vrot.slane %v4934_v44, %v4723_v28 }
 0x2b9   : > { %v1853_v20 = vrot.slane %v4934_v44, %v4726_v29  ;;  %v1857_v26 = vrot.slane %v4934_v44, %v4729_v30  ;;  %v3224_v33 = vcombine.low %v1829_v4, %v1833_v2  ;;  %v3225_v35 = vcombine.low %v1837_v9, %v1841_v10 }
 0x2ba   : > { %3772 = vperm.xlu0 %4305, %v3125_v15   ;;  %v2620_v38 = vcombine.low %v2611_v13, %v2618_v48  ;;  %v2627_v31 = vrot.slane %v2619_v18, %v4734_v34  ;;  %v3226_v39 = vcombine.low %v1845_v12, %v1849_v50  ;;  %v5106_v41 = vadd.f32 %v4708_v22, %v1026_v43  ;;  %v1029_v18 = vpop.xlane.xlu0 %1028 }
 0x2bb   : > { %v3227_v36 = vcombine.low %v1853_v20, %v1857_v26  ;;  %v3234_v42 = vrot.slane %v3224_v33, %v4734_v34  ;;  %v3241_v57 = vrot.slane %v3225_v35, %v4734_v34  ;;  %v1637_v49 = vrot.slane %v4906_v1, %v4705_v19 }
 0x2bc   : > { %v2634_v44 = vrot.slane %v2620_v38, %v4734_v34  ;;  %v3248_v51 = vrot.slane %v3226_v39, %v4734_v34  ;;  %v1641_v52 = vrot.slane %v4906_v1, %v4711_v23  ;;  %v1645_v37 = vrot.slane %v4906_v1, %v4714_v24 }
 0x2bd   : > { %v3255_v54 = vrot.slane %v3227_v36, %v4734_v34  ;;  %v3256_v55 = vcombine.low %v3234_v42, %v3241_v57  ;;  %v1649_v56 = vrot.slane %v4906_v1, %v4717_v25  ;;  %v1653_v45 = vrot.slane %v4906_v1, %v4720_v27 }
 0x2be   : > { %v2635_v58 = vcombine.low %v2627_v31, %v2634_v44  ;;  %v1657_v60 = vrot.slane %v4906_v1, %v4723_v28  ;;  %v1661_v11 = vrot.slane %v4906_v1, %v4726_v29  ;;  %v1665_v61 = vrot.slane %v4906_v1, %v4729_v30 }
 0x2bf   : > { %v3257_v62 = vcombine.low %v3248_v51, %v3255_v54  ;;  %v3264_v63 = vrot.slane %v3256_v55, %v4734_v34  ;;  %v2930_v4 = vcombine.low %v1637_v49, %v1641_v52  ;;  %v2931_v2 = vcombine.low %v1645_v37, %v1649_v56 }
 0x2c0   : > { %3742 = vperm.xlu1 %4304, %v2635_v58   ;;  %v2932_v59 = vcombine.low %v1653_v45, %v1657_v60  ;;  %v2933_v5 = vcombine.low %v1661_v11, %v1665_v61  ;;  %v1765_v6 = vrot.slane %v4962_v14, %v4705_v19  ;;  %v1769_v8 = vrot.slane %v4962_v14, %v4711_v23 }
 0x2c1   : > { %v3271_v13 = vrot.slane %v3257_v62, %v4734_v34  ;;  %v2940_v9 = vrot.slane %v2930_v4, %v4734_v34  ;;  %v2947_v1 = vrot.slane %v2931_v2, %v4734_v34  ;;  %v1773_v10 = vrot.slane %v4962_v14, %v4714_v24 }
 0x2c2   : > { %v2954_v12 = vrot.slane %v2932_v59, %v4734_v34  ;;  %v2961_v43 = vrot.slane %v2933_v5, %v4734_v34  ;;  %v1777_v15 = vrot.slane %v4962_v14, %v4717_v25  ;;  %v1781_v48 = vrot.slane %v4962_v14, %v4720_v27 }
 0x2c3   : > { %v3272_v50 = vcombine.low %v3264_v63, %v3271_v13  ;;  %v2962_v20 = vcombine.low %v2940_v9, %v2947_v1  ;;  %v1785_v26 = vrot.slane %v4962_v14, %v4723_v28  ;;  %v1789_v33 = vrot.slane %v4962_v14, %v4726_v29 }
 0x2c4   : > { %v2963_v35 = vcombine.low %v2954_v12, %v2961_v43  ;;  %v1793_v38 = vrot.slane %v4962_v14, %v4729_v30  ;;  %v3126_v31 = vcombine.low %v1765_v6, %v1769_v8  ;;  %v3127_v39 = vcombine.low %v1773_v10, %v1777_v15 }
 0x2c5   : > { %3781 = vperm.xlu0 %4305, %v3272_v50   ;;  %v2970_v36 = vrot.slane %v2962_v20, %v4734_v34  ;;  %v3128_v42 = vcombine.low %v1781_v48, %v1785_v26  ;;  %v5153_v57 = vadd.f32 %v4708_v22, %v1029_v18  ;;  %v1669_v49 = vrot.slane %v4911_v7, %v4705_v19  ;;  %v1044_v20 = vpop.xlane.xlu0 %1043 }
 0x2c6   : > { %v2977_v44 = vrot.slane %v2963_v35, %v4734_v34  ;;  %v3129_v51 = vcombine.low %v1789_v33, %v1793_v38  ;;  %v3136_v52 = vrot.slane %v3126_v31, %v4734_v34  ;;  %v3143_v37 = vrot.slane %v3127_v39, %v4734_v34 }
 0x2c7   : > { %v3150_v14 = vrot.slane %v3128_v42, %v4734_v34  ;;  %v1673_v54 = vrot.slane %v4911_v7, %v4711_v23  ;;  %v1677_v55 = vrot.slane %v4911_v7, %v4714_v24  ;;  %v1681_v56 = vrot.slane %v4911_v7, %v4717_v25 }
 0x2c8   : > { %v2978_v45 = vcombine.low %v2970_v36, %v2977_v44  ;;  %v3157_v58 = vrot.slane %v3129_v51, %v4734_v34  ;;  %v3158_v60 = vcombine.low %v3136_v52, %v3143_v37  ;;  %v1685_v11 = vrot.slane %v4911_v7, %v4720_v27 }
 0x2c9   : > { %v1689_v61 = vrot.slane %v4911_v7, %v4723_v28  ;;  %v1693_v62 = vrot.slane %v4911_v7, %v4726_v29  ;;  %v1697_v63 = vrot.slane %v4911_v7, %v4729_v30  ;;  %v2979_v4 = vcombine.low %v1669_v49, %v1673_v54 }
 0x2ca   : > { %3763 = vperm.xlu1 %4304, %v2978_v45   ;;  %v3159_v2 = vcombine.low %v3150_v14, %v3157_v58  ;;  %v3166_v59 = vrot.slane %v3158_v60, %v4734_v34  ;;  %v2980_v5 = vcombine.low %v1677_v55, %v1681_v56  ;;  %v1861_v6 = vrot.slane %v5008_v53, %v4705_v19 }
 0x2cb   : > { %v2981_v8 = vcombine.low %v1685_v11, %v1689_v61  ;;  %v2982_v13 = vcombine.low %v1693_v62, %v1697_v63  ;;  %v2989_v9 = vrot.slane %v2979_v4, %v4734_v34  ;;  %v1865_v1 = vrot.slane %v5008_v53, %v4711_v23 }
 0x2cc   : > { %v3173_v10 = vrot.slane %v3159_v2, %v4734_v34  ;;  %v2996_v7 = vrot.slane %v2980_v5, %v4734_v34  ;;  %v1869_v12 = vrot.slane %v5008_v53, %v4714_v24  ;;  %v1873_v43 = vrot.slane %v5008_v53, %v4717_v25 }
 0x2cd   : > { %v3003_v15 = vrot.slane %v2981_v8, %v4734_v34  ;;  %v3010_v48 = vrot.slane %v2982_v13, %v4734_v34  ;;  %v1877_v18 = vrot.slane %v5008_v53, %v4720_v27  ;;  %v1881_v50 = vrot.slane %v5008_v53, %v4723_v28 }
 0x2ce   : > { %v3174_v26 = vcombine.low %v3166_v59, %v3173_v10  ;;  %v3011_v33 = vcombine.low %v2989_v9, %v2996_v7  ;;  %v1885_v35 = vrot.slane %v5008_v53, %v4726_v29  ;;  %v1889_v38 = vrot.slane %v5008_v53, %v4729_v30 }
 0x2cf   : > { %v3012_v31 = vcombine.low %v3003_v15, %v3010_v48  ;;  %v3273_v39 = vcombine.low %v1861_v6, %v1865_v1  ;;  %v3274_v36 = vcombine.low %v1869_v12, %v1873_v43  ;;  %v3275_v42 = vcombine.low %v1877_v18, %v1881_v50  ;;  %v1038_v48 = vpop.xlane.xlu0 %1037 }
 0x2d0   : > { %3775 = vperm.xlu0 %4305, %v3174_v26   ;;  %v3019_v49 = vrot.slane %v3011_v33, %v4734_v34  ;;  %v3276_v44 = vcombine.low %v1885_v35, %v1889_v38  ;;  %v5200_v51 = vadd.f32 %v4708_v22, %v1044_v20  ;;  %v1509_v52 = vrot.slane %v4857_v0, %v4705_v19 }
 0x2d1   : > { %v3026_v37 = vrot.slane %v3012_v31, %v4734_v34  ;;  %v3283_v14 = vrot.slane %v3273_v39, %v4734_v34  ;;  %v3290_v53 = vrot.slane %v3274_v36, %v4734_v34  ;;  %v3297_v54 = vrot.slane %v3275_v42, %v4734_v34 }
 0x2d2   : > { %v3304_v55 = vrot.slane %v3276_v44, %v4734_v34  ;;  %v1513_v56 = vrot.slane %v4857_v0, %v4711_v23  ;;  %v1517_v45 = vrot.slane %v4857_v0, %v4714_v24  ;;  %v1521_v58 = vrot.slane %v4857_v0, %v4717_v25 }
 0x2d3   : > { %v3027_v60 = vcombine.low %v3019_v49, %v3026_v37  ;;  %v3305_v11 = vcombine.low %v3283_v14, %v3290_v53  ;;  %v1525_v61 = vrot.slane %v4857_v0, %v4720_v27  ;;  %v1529_v62 = vrot.slane %v4857_v0, %v4723_v28 }
 0x2d4   : > { %v3306_v63 = vcombine.low %v3297_v54, %v3304_v55  ;;  %v1533_v4 = vrot.slane %v4857_v0, %v4726_v29  ;;  %v1537_v2 = vrot.slane %v4857_v0, %v4729_v30  ;;  %v2734_v59 = vcombine.low %v1509_v52, %v1513_v56 }
 0x2d5   : > { %3766 = vperm.xlu1 %4304, %v3027_v60   ;;  %v3313_v5 = vrot.slane %v3305_v11, %v4734_v34  ;;  %v2735_v6 = vcombine.low %v1517_v45, %v1521_v58  ;;  %v2736_v8 = vcombine.low %v1525_v61, %v1529_v62  ;;  %v1797_v13 = vrot.slane %v4937_v47, %v4705_v19 }
 0x2d6   : > { %v3320_v9 = vrot.slane %v3306_v63, %v4734_v34  ;;  %v2737_v1 = vcombine.low %v1533_v4, %v1537_v2  ;;  %v2744_v10 = vrot.slane %v2734_v59, %v4734_v34  ;;  %v1801_v7 = vrot.slane %v4937_v47, %v4711_v23 }
 0x2d7   : > { %v2751_v12 = vrot.slane %v2735_v6, %v4734_v34  ;;  %v2758_v0 = vrot.slane %v2736_v8, %v4734_v34  ;;  %v1805_v43 = vrot.slane %v4937_v47, %v4714_v24  ;;  %v1809_v15 = vrot.slane %v4937_v47, %v4717_v25 }
 0x2d8   : > { %v3321_v18 = vcombine.low %v3313_v5, %v3320_v9  ;;  %v2765_v50 = vrot.slane %v2737_v1, %v4734_v34  ;;  %v1813_v20 = vrot.slane %v4937_v47, %v4720_v27  ;;  %v1817_v26 = vrot.slane %v4937_v47, %v4723_v28 }
 0x2d9   : > { %v2766_v33 = vcombine.low %v2744_v10, %v2751_v12  ;;  %v1821_v35 = vrot.slane %v4937_v47, %v4726_v29  ;;  %v1825_v38 = vrot.slane %v4937_v47, %v4729_v30  ;;  %v3175_v31 = vcombine.low %v1797_v13, %v1801_v7 }
 0x2da   : > { %3784 = vperm.xlu0 %4305, %v3321_v18   ;;  %v2767_v39 = vcombine.low %v2758_v0, %v2765_v50  ;;  %v3176_v36 = vcombine.low %v1805_v43, %v1809_v15  ;;  %v3177_v42 = vcombine.low %v1813_v20, %v1817_v26  ;;  %v5246_v49 = vadd.f32 %v4708_v22, %v1038_v48  ;;  %v1041_v48 = vpop.xlane.xlu0 %1040 }
 0x2db   : > { %v2774_v44 = vrot.slane %v2766_v33, %v4734_v34  ;;  %v3178_v52 = vcombine.low %v1821_v35, %v1825_v38  ;;  %v3185_v37 = vrot.slane %v3175_v31, %v4734_v34  ;;  %v1541_v14 = vrot.slane %v4861_v3, %v4705_v19 }
 0x2dc   : > { %v2781_v53 = vrot.slane %v2767_v39, %v4734_v34  ;;  %v3192_v47 = vrot.slane %v3176_v36, %v4734_v34  ;;  %v3199_v54 = vrot.slane %v3177_v42, %v4734_v34  ;;  %v1545_v55 = vrot.slane %v4861_v3, %v4711_v23 }
 0x2dd   : > { %v3206_v56 = vrot.slane %v3178_v52, %v4734_v34  ;;  %v1549_v45 = vrot.slane %v4861_v3, %v4714_v24  ;;  %v1553_v58 = vrot.slane %v4861_v3, %v4717_v25  ;;  %v1557_v60 = vrot.slane %v4861_v3, %v4720_v27 }
 0x2de   : > { %v2782_v11 = vcombine.low %v2774_v44, %v2781_v53  ;;  %v3207_v61 = vcombine.low %v3185_v37, %v3192_v47  ;;  %v1561_v62 = vrot.slane %v4861_v3, %v4723_v28  ;;  %v1565_v63 = vrot.slane %v4861_v3, %v4726_v29 }
 0x2df   : > { %v3208_v4 = vcombine.low %v3199_v54, %v3206_v56  ;;  %v1569_v2 = vrot.slane %v4861_v3, %v4729_v30  ;;  %v2783_v59 = vcombine.low %v1541_v14, %v1545_v55  ;;  %v2784_v5 = vcombine.low %v1549_v45, %v1553_v58 }
 0x2e0   : > { %3751 = vperm.xlu1 %4304, %v2782_v11   ;;  %v3215_v6 = vrot.slane %v3207_v61, %v4734_v34  ;;  %v2785_v8 = vcombine.low %v1557_v60, %v1561_v62  ;;  %v1957_v13 = vrot.slane %v5058_v21, %v4705_v19  ;;  %v1961_v9 = vrot.slane %v5058_v21, %v4711_v23 }
 0x2e1   : > { %v3222_v1 = vrot.slane %v3208_v4, %v4734_v34  ;;  %v2786_v10 = vcombine.low %v1565_v63, %v1569_v2  ;;  %v2793_v7 = vrot.slane %v2783_v59, %v4734_v34  ;;  %v2800_v12 = vrot.slane %v2784_v5, %v4734_v34 }
 0x2e2   : > { %v2807_v3 = vrot.slane %v2785_v8, %v4734_v34  ;;  %v1965_v0 = vrot.slane %v5058_v21, %v4714_v24  ;;  %v1969_v43 = vrot.slane %v5058_v21, %v4717_v25  ;;  %v1973_v15 = vrot.slane %v5058_v21, %v4720_v27 }
 0x2e3   : > { %v3223_v18 = vcombine.low %v3215_v6, %v3222_v1  ;;  %v2814_v50 = vrot.slane %v2786_v10, %v4734_v34  ;;  %v2815_v20 = vcombine.low %v2793_v7, %v2800_v12  ;;  %v1977_v26 = vrot.slane %v5058_v21, %v4723_v28 }
 0x2e4   : > { %v1981_v33 = vrot.slane %v5058_v21, %v4726_v29  ;;  %v1985_v35 = vrot.slane %v5058_v21, %v4729_v30  ;;  %v3420_v38 = vcombine.low %v1957_v13, %v1961_v9  ;;  %v3421_v31 = vcombine.low %v1965_v0, %v1969_v43 }
 0x2e5   : > { %3778 = vperm.xlu0 %4305, %v3223_v18   ;;  %v2816_v39 = vcombine.low %v2807_v3, %v2814_v50  ;;  %v2823_v36 = vrot.slane %v2815_v20, %v4734_v34  ;;  %v3422_v42 = vcombine.low %v1973_v15, %v1977_v26  ;;  %v5294_v44 = vadd.f32 %v4708_v22, %v1041_v48  ;;  %v1047_v15 = vpop.xlane.xlu0 %1046 }
 0x2e6   : > { %v3423_v52 = vcombine.low %v1981_v33, %v1985_v35  ;;  %v3430_v37 = vrot.slane %v3420_v38, %v4734_v34  ;;  %v3437_v14 = vrot.slane %v3421_v31, %v4734_v34  ;;  %v1573_v53 = vrot.slane %v4835_v40, %v4705_v19 }
 0x2e7   : > { %v2830_v21 = vrot.slane %v2816_v39, %v4734_v34  ;;  %v3444_v47 = vrot.slane %v3422_v42, %v4734_v34  ;;  %v1577_v54 = vrot.slane %v4835_v40, %v4711_v23  ;;  %v1581_v55 = vrot.slane %v4835_v40, %v4714_v24 }
 0x2e8   : > { %v3451_v56 = vrot.slane %v3423_v52, %v4734_v34  ;;  %v3452_v45 = vcombine.low %v3430_v37, %v3437_v14  ;;  %v1585_v58 = vrot.slane %v4835_v40, %v4717_v25  ;;  %v1589_v60 = vrot.slane %v4835_v40, %v4720_v27 }
 0x2e9   : > { %v2831_v11 = vcombine.low %v2823_v36, %v2830_v21  ;;  %v1593_v61 = vrot.slane %v4835_v40, %v4723_v28  ;;  %v1597_v62 = vrot.slane %v4835_v40, %v4726_v29  ;;  %v1601_v63 = vrot.slane %v4835_v40, %v4729_v30 }
 0x2ea   : > { %v3453_v4 = vcombine.low %v3444_v47, %v3451_v56  ;;  %v3460_v2 = vrot.slane %v3452_v45, %v4734_v34  ;;  %v2832_v59 = vcombine.low %v1573_v53, %v1577_v54  ;;  %v2833_v5 = vcombine.low %v1581_v55, %v1585_v58 }
 0x2eb   : > { %3754 = vperm.xlu1 %4304, %v2831_v11   ;;  %v2834_v6 = vcombine.low %v1589_v60, %v1593_v61  ;;  %v2835_v8 = vcombine.low %v1597_v62, %v1601_v63  ;;  %v1893_v13 = vrot.slane %v5106_v41, %v4705_v19  ;;  %v1897_v9 = vrot.slane %v5106_v41, %v4711_v23 }
 0x2ec   : > { %v3467_v1 = vrot.slane %v3453_v4, %v4734_v34  ;;  %v2842_v10 = vrot.slane %v2832_v59, %v4734_v34  ;;  %v2849_v40 = vrot.slane %v2833_v5, %v4734_v34  ;;  %v1901_v7 = vrot.slane %v5106_v41, %v4714_v24 }
 0x2ed   : > { %v2856_v12 = vrot.slane %v2834_v6, %v4734_v34  ;;  %v2863_v3 = vrot.slane %v2835_v8, %v4734_v34  ;;  %v1905_v0 = vrot.slane %v5106_v41, %v4717_v25  ;;  %v1909_v43 = vrot.slane %v5106_v41, %v4720_v27 }
 0x2ee   : > { %v3468_v48 = vcombine.low %v3460_v2, %v3467_v1  ;;  %v2864_v18 = vcombine.low %v2842_v10, %v2849_v40  ;;  %v1913_v50 = vrot.slane %v5106_v41, %v4723_v28  ;;  %v1917_v20 = vrot.slane %v5106_v41, %v4726_v29 }
 0x2ef   : > { %v2865_v26 = vcombine.low %v2856_v12, %v2863_v3  ;;  %v1921_v33 = vrot.slane %v5106_v41, %v4729_v30  ;;  %v3322_v35 = vcombine.low %v1893_v13, %v1897_v9  ;;  %v3323_v38 = vcombine.low %v1901_v7, %v1905_v0 }
 0x2f0   : > { %3793 = vperm.xlu0 %4305, %v3468_v48   ;;  %v2872_v31 = vrot.slane %v2864_v18, %v4734_v34  ;;  %v3324_v39 = vcombine.low %v1909_v43, %v1913_v50  ;;  %v5341_v36 = vadd.f32 %v4708_v22, %v1047_v15  ;;  %v1605_v42 = vrot.slane %v4840_v46, %v4705_v19 }
 0x2f1   : > { %v2879_v52 = vrot.slane %v2865_v26, %v4734_v34  ;;  %v3325_v37 = vcombine.low %v1917_v20, %v1921_v33  ;;  %v3332_v14 = vrot.slane %v3322_v35, %v4734_v34  ;;  %v3339_v53 = vrot.slane %v3323_v38, %v4734_v34 }
 0x2f2   : > { %v3346_v41 = vrot.slane %v3324_v39, %v4734_v34  ;;  %v1609_v21 = vrot.slane %v4840_v46, %v4711_v23  ;;  %v1613_v47 = vrot.slane %v4840_v46, %v4714_v24  ;;  %v1617_v22 = vrot.slane %v4840_v46, %v4717_v25 }
 0x2f3   : > { %v2880_v54 = vcombine.low %v2872_v31, %v2879_v52  ;;  %v3353_v55 = vrot.slane %v3325_v37, %v4734_v34  ;;  %v3354_v56 = vcombine.low %v3332_v14, %v3339_v53  ;;  %v1621_v45 = vrot.slane %v4840_v46, %v4720_v27 }
 0x2f4   : > { %v1625_v58 = vrot.slane %v4840_v46, %v4723_v28  ;;  %v1629_v60 = vrot.slane %v4840_v46, %v4726_v29  ;;  %v1633_v11 = vrot.slane %v4840_v46, %v4729_v30  ;;  %v2881_v61 = vcombine.low %v1605_v42, %v1609_v21 }
 0x2f5   : > { %3757 = vperm.xlu1 %4304, %v2880_v54   ;;  %v3355_v62 = vcombine.low %v3346_v41, %v3353_v55  ;;  %v3362_v63 = vrot.slane %v3354_v56, %v4734_v34  ;;  %v2882_v4 = vcombine.low %v1613_v47, %v1617_v22  ;;  %v1989_v2 = vrot.slane %v5013_v32, %v4705_v19 }
 0x2f6   : > { %v2883_v59 = vcombine.low %v1621_v45, %v1625_v58  ;;  %v2884_v5 = vcombine.low %v1629_v60, %v1633_v11  ;;  %v2891_v6 = vrot.slane %v2881_v61, %v4734_v34  ;;  %v1993_v8 = vrot.slane %v5013_v32, %v4711_v23 }
 0x2f7   : > { %v3369_v13 = vrot.slane %v3355_v62, %v4734_v34  ;;  %v2898_v46 = vrot.slane %v2882_v4, %v4734_v34  ;;  %v1997_v9 = vrot.slane %v5013_v32, %v4714_v24  ;;  %v2001_v1 = vrot.slane %v5013_v32, %v4717_v25 }
 0x2f8   : > { %v2905_v10 = vrot.slane %v2883_v59, %v4734_v34  ;;  %v2912_v40 = vrot.slane %v2884_v5, %v4734_v34  ;;  %v2005_v7 = vrot.slane %v5013_v32, %v4720_v27  ;;  %v2009_v12 = vrot.slane %v5013_v32, %v4723_v28 }
 0x2f9   : > { %v3370_v3 = vcombine.low %v3362_v63, %v3369_v13  ;;  %v2913_v0 = vcombine.low %v2891_v6, %v2898_v46  ;;  %v2013_v43 = vrot.slane %v5013_v32, %v4726_v29  ;;  %v2017_v15 = vrot.slane %v5013_v32, %v4729_v30 }
 0x2fa   : > { %v2914_v48 = vcombine.low %v2905_v10, %v2912_v40  ;;  %v3469_v18 = vcombine.low %v1989_v2, %v1993_v8  ;;  %v3470_v50 = vcombine.low %v1997_v9, %v2001_v1  ;;  %v3471_v20 = vcombine.low %v2005_v7, %v2009_v12 }
 0x2fb   : > { %3787 = vperm.xlu0 %4305, %v3370_v3   ;;  %v2921_v26 = vrot.slane %v2913_v0, %v4734_v34  ;;  %v3472_v33 = vcombine.low %v2013_v43, %v2017_v15  ;;  %v1925_v35 = vrot.slane %v5153_v57, %v4705_v19  ;;  %v1929_v38 = vrot.slane %v5153_v57, %v4711_v23 }
 0x2fc   : > { %v2928_v31 = vrot.slane %v2914_v48, %v4734_v34  ;;  %v3479_v39 = vrot.slane %v3469_v18, %v4734_v34  ;;  %v3486_v32 = vrot.slane %v3470_v50, %v4734_v34  ;;  %v3493_v42 = vrot.slane %v3471_v20, %v4734_v34 }
 0x2fd   : > { %v3500_v52 = vrot.slane %v3472_v33, %v4734_v34  ;;  %v1933_v37 = vrot.slane %v5153_v57, %v4714_v24  ;;  %v1937_v14 = vrot.slane %v5153_v57, %v4717_v25  ;;  %v1941_v53 = vrot.slane %v5153_v57, %v4720_v27 }
 0x2fe   : > { %v2929_v41 = vcombine.low %v2921_v26, %v2928_v31  ;;  %v3501_v21 = vcombine.low %v3479_v39, %v3486_v32  ;;  %v1945_v47 = vrot.slane %v5153_v57, %v4723_v28  ;;  %v1949_v22 = vrot.slane %v5153_v57, %v4726_v29 }
 0x2ff   : > { %v3502_v54 = vcombine.low %v3493_v42, %v3500_v52  ;;  %v1953_v55 = vrot.slane %v5153_v57, %v4729_v30  ;;  %v3371_v56 = vcombine.low %v1925_v35, %v1929_v38  ;;  %v3372_v45 = vcombine.low %v1933_v37, %v1937_v14 }
 0x300   : > { %3760 = vperm.xlu1 %4304, %v2929_v41   ;;  %v3509_v58 = vrot.slane %v3501_v21, %v4734_v34  ;;  %v3373_v60 = vcombine.low %v1941_v53, %v1945_v47  ;;  %v2085_v11 = vrot.slane %v5200_v51, %v4705_v19  ;;  %v2089_v61 = vrot.slane %v5200_v51, %v4711_v23 }
 0x301   : > { %v3516_v62 = vrot.slane %v3502_v54, %v4734_v34  ;;  %v3374_v63 = vcombine.low %v1949_v22, %v1953_v55  ;;  %v3381_v4 = vrot.slane %v3371_v56, %v4734_v34  ;;  %v3388_v2 = vrot.slane %v3372_v45, %v4734_v34 }
 0x302   : > { %v3395_v57 = vrot.slane %v3373_v60, %v4734_v34  ;;  %v2093_v59 = vrot.slane %v5200_v51, %v4714_v24  ;;  %v2097_v5 = vrot.slane %v5200_v51, %v4717_v25  ;;  %v2101_v6 = vrot.slane %v5200_v51, %v4720_v27 }
 0x303   : > { %v3517_v8 = vcombine.low %v3509_v58, %v3516_v62  ;;  %v3402_v13 = vrot.slane %v3374_v63, %v4734_v34  ;;  %v3403_v46 = vcombine.low %v3381_v4, %v3388_v2  ;;  %v2105_v9 = vrot.slane %v5200_v51, %v4723_v28 }
 0x304   : > { %v2109_v1 = vrot.slane %v5200_v51, %v4726_v29  ;;  %v2113_v10 = vrot.slane %v5200_v51, %v4729_v30  ;;  %v3616_v40 = vcombine.low %v2085_v11, %v2089_v61  ;;  %v3617_v7 = vcombine.low %v2093_v59, %v2097_v5 }
 0x305   : > { %3796 = vperm.xlu0 %4305, %v3517_v8   ;;  %v3404_v12 = vcombine.low %v3395_v57, %v3402_v13  ;;  %v3411_v3 = vrot.slane %v3403_v46, %v4734_v34  ;;  %v3618_v0 = vcombine.low %v2101_v6, %v2105_v9  ;;  %v2021_v43 = vrot.slane %v5246_v49, %v4705_v19 }
 0x306   : > { %v3619_v15 = vcombine.low %v2109_v1, %v2113_v10  ;;  %v3626_v48 = vrot.slane %v3616_v40, %v4734_v34  ;;  %v3633_v18 = vrot.slane %v3617_v7, %v4734_v34  ;;  %v2025_v50 = vrot.slane %v5246_v49, %v4711_v23 }
 0x307   : > { %v3418_v51 = vrot.slane %v3404_v12, %v4734_v34  ;;  %v3640_v20 = vrot.slane %v3618_v0, %v4734_v34  ;;  %v2029_v26 = vrot.slane %v5246_v49, %v4714_v24  ;;  %v2033_v33 = vrot.slane %v5246_v49, %v4717_v25 }
 0x308   : > { %v3647_v35 = vrot.slane %v3619_v15, %v4734_v34  ;;  %v3648_v38 = vcombine.low %v3626_v48, %v3633_v18  ;;  %v2037_v31 = vrot.slane %v5246_v49, %v4720_v27  ;;  %v2041_v39 = vrot.slane %v5246_v49, %v4723_v28 }
 0x309   : > { %v3419_v32 = vcombine.low %v3411_v3, %v3418_v51  ;;  %v2045_v42 = vrot.slane %v5246_v49, %v4726_v29  ;;  %v2049_v52 = vrot.slane %v5246_v49, %v4729_v30  ;;  %v3518_v37 = vcombine.low %v2021_v43, %v2025_v50 }
 0x30a   : > { %v3649_v14 = vcombine.low %v3640_v20, %v3647_v35  ;;  %v3656_v53 = vrot.slane %v3648_v38, %v4734_v34  ;;  %v3519_v41 = vcombine.low %v2029_v26, %v2033_v33  ;;  %v3520_v21 = vcombine.low %v2037_v31, %v2041_v39 }
 0x30b   : > { %3790 = vperm.xlu0 %4305, %v3419_v32   ;;  %v3521_v47 = vcombine.low %v2045_v42, %v2049_v52  ;;  %v3528_v22 = vrot.slane %v3518_v37, %v4734_v34  ;;  %v2053_v54 = vrot.slane %v5294_v44, %v4705_v19  ;;  %v2057_v55 = vrot.slane %v5294_v44, %v4711_v23  ;;  %v3722_v42 = vpop.permute.xlu1 %3721 }
 0x30c   : > { %v3663_v56 = vrot.slane %v3649_v14, %v4734_v34  ;;  %v3535_v49 = vrot.slane %v3519_v41, %v4734_v34  ;;  %v3542_v45 = vrot.slane %v3520_v21, %v4734_v34  ;;  %v2061_v58 = vrot.slane %v5294_v44, %v4714_v24  ;;  %v3716_v41 = vpop.permute.xlu0 %3715 }
 0x30d   : > { %v3549_v60 = vrot.slane %v3521_v47, %v4734_v34  ;;  %v2065_v11 = vrot.slane %v5294_v44, %v4717_v25  ;;  %v2069_v61 = vrot.slane %v5294_v44, %v4720_v27  ;;  %v2073_v62 = vrot.slane %v5294_v44, %v4723_v28 }
 0x30e   : > { %v3664_v63 = vcombine.low %v3656_v53, %v3663_v56  ;;  %v3550_v4 = vcombine.low %v3528_v22, %v3535_v49  ;;  %v2077_v2 = vrot.slane %v5294_v44, %v4726_v29  ;;  %v2081_v57 = vrot.slane %v5294_v44, %v4729_v30 }
 0x30f   : > { %v3551_v59 = vcombine.low %v3542_v45, %v3549_v60  ;;  %v3567_v5 = vcombine.low %v2053_v54, %v2057_v55  ;;  %v3568_v6 = vcombine.low %v2061_v58, %v2065_v11  ;;  %v3569_v8 = vcombine.low %v2069_v61, %v2073_v62  ;;  %v5504_v52 = vpop.permute.xlu1 %3724 }
 0x310   : > { %3805 = vperm.xlu0 %4305, %v3664_v63   ;;  %v3558_v13 = vrot.slane %v3550_v4, %v4734_v34  ;;  %v3570_v46 = vcombine.low %v2077_v2, %v2081_v57  ;;  %v2117_v9 = vrot.slane %v5341_v36, %v4705_v19  ;;  %v2121_v1 = vrot.slane %v5341_v36, %v4711_v23 }
 0x311   : > { %v3565_v10 = vrot.slane %v3551_v59, %v4734_v34  ;;  %v3577_v40 = vrot.slane %v3567_v5, %v4734_v34  ;;  %v3584_v44 = vrot.slane %v3568_v6, %v4734_v34  ;;  %v3591_v7 = vrot.slane %v3569_v8, %v4734_v34 }
 0x312   : > { %v3598_v12 = vrot.slane %v3570_v46, %v4734_v34  ;;  %v2125_v3 = vrot.slane %v5341_v36, %v4714_v24  ;;  %v2129_v0 = vrot.slane %v5341_v36, %v4717_v25  ;;  %v2133_v19 = vrot.slane %v5341_v36, %v4720_v27 }
 0x313   : > { %v3566_v23 = vcombine.low %v3558_v13, %v3565_v10  ;;  %v3599_v43 = vcombine.low %v3577_v40, %v3584_v44  ;;  %v2137_v15 = vrot.slane %v5341_v36, %v4723_v28  ;;  %v2141_v48 = vrot.slane %v5341_v36, %v4726_v29  ;;  %v3719_v37 = vpop.permute.xlu1 %3718 }
 0x314   : > { %v3600_v18 = vcombine.low %v3591_v7, %v3598_v12  ;;  %v2145_v50 = vrot.slane %v5341_v36, %v4729_v30  ;;  %v3665_v51 = vcombine.low %v2117_v9, %v2121_v1  ;;  %v3666_v24 = vcombine.low %v2125_v3, %v2129_v0 }
 0x315   : > { %3799 = vperm.xlu0 %4305, %v3566_v23   ;;  %v3607_v25 = vrot.slane %v3599_v43, %v4734_v34  ;;  %v3667_v20 = vcombine.low %v2133_v19, %v2137_v15  ;;  %v5527_v63 = vand.u32 127, %v1054_v16 }
 0x316   : > { %v3614_v27 = vrot.slane %v3600_v18, %v4734_v34  ;;  %v3668_v26 = vcombine.low %v2141_v48, %v2145_v50  ;;  %v3675_v33 = vrot.slane %v3665_v51, %v4734_v34  ;;  %v3682_v28 = vrot.slane %v3666_v24, %v4734_v34 }
 0x317   : > { %v3689_v35 = vrot.slane %v3667_v20, %v4734_v34  ;;  %v5506_v14 = vpop.permute.xlu1 %3733  ;;  %v3816_v4 = vadd.s32 4294967288, %v5527_v63  ;;  %v3823_v5 = vadd.s32 4294967280, %v5527_v63  ;;  %v3814_v6 = vsub.s32 %v5527_v63, %v4702_v17 }
 0x318   : > { %v3615_v29 = vcombine.low %v3607_v25, %v3614_v27  ;;  %v3696_v38 = vrot.slane %v3668_v26, %v4734_v34  ;;  %v3697_v31 = vcombine.low %v3675_v33, %v3682_v28  ;;  %v3830_v46 = vadd.s32 4294967272, %v5527_v63 }
 0x319   : > { %v3819_v59 = vsub.s32 %v3816_v4, %v4702_v17  ;;  %v3826_v1 = vsub.s32 %v3823_v5, %v4702_v17  ;;  %v3837_v40 = vadd.s32 4294967264, %v5527_v63  ;;  %v3844_v3 = vadd.s32 4294967256, %v5527_v63 }
 0x31a   : > { %3802 = vperm.xlu0 %4305, %v3615_v29   ;;  %v3698_v30 = vcombine.low %v3689_v35, %v3696_v38  ;;  %v3705_v36 = vrot.slane %v3697_v31, %v4734_v34  ;;  %v3833_v7 = vsub.s32 %v3830_v46, %v4702_v17  ;;  %v3815_v23 = vrot.slane %v3716_v41, %v3814_v6 }
 0x31b   : > { %v5508_v53 = vpop.permute.xlu1 %3727  ;;  %v3820_v12 = vrot.slane %v3719_v37, %v3819_v59  ;;  %v3840_v15 = vsub.s32 %v3837_v40, %v4702_v17  ;;  %v3847_v18 = vsub.s32 %v3844_v3, %v4702_v17  ;;  %v3827_v51 = vrot.slane %v3722_v42, %v3826_v1 }
 0x31c   : > { %v3712_v39 = vrot.slane %v3698_v30, %v4734_v34  ;;  %v3851_v24 = vadd.s32 4294967248, %v5527_v63  ;;  %v3858_v27 = vadd.s32 4294967240, %v5527_v63  ;;  %v3865_v29 = vadd.s32 4294967232, %v5527_v63 }
 0x31d   : > { %v3822_v48 = vsel %vm3821_vm2, %v3820_v12, %v3815_v23  ;;  %v3841_v35 = vrot.slane %v5508_v53, %v3840_v15  ;;  %v3834_v31 = vrot.slane %v5504_v52, %v3833_v7  ;;  %v3893_v46 = vadd.s32 4294967200, %v5527_v63 }
 0x31e   : > { %v3713_v32 = vcombine.low %v3705_v36, %v3712_v39  ;;  %v3829_v28 = vsel %vm3828_vm3, %v3827_v51, %v3822_v48  ;;  %v3872_v36 = vadd.s32 4294967224, %v5527_v63  ;;  %v3854_v39 = vsub.s32 %v3851_v24, %v4702_v17 }
 0x31f   : > { %v5510_v21 = vpop.permute.xlu1 %3736  ;;  %v3861_v42 = vsub.s32 %v3858_v27, %v4702_v17  ;;  %v3868_v41 = vsub.s32 %v3865_v29, %v4702_v17  ;;  %v3896_v3 = vsub.s32 %v3893_v46, %v4702_v17 }
 0x320   : > { %3808 = vperm.xlu0 %4305, %v3713_v32   ;;  %v3836_v32 = vsel %vm3835_vm4, %v3834_v31, %v3829_v28 }
 0x321   : > { %v3843_v53 = vsel %vm3842_vm5, %v3841_v35, %v3836_v32 }
 0x323   : > { %v5512_v22 = vpop.permute.xlu1 %3730 }
 0x324   : > { %v3848_v30 = vrot.slane %v5512_v22, %v3847_v18 }
 0x326   : > { %v3850_v22 = vsel %vm3849_vm6, %v3848_v30, %v3843_v53 }
 0x327   : > { %v5514_v55 = vpop.permute.xlu1 %3745 }
 0x32b   : > { %v5518_v49 = vpop.permute.xlu1 %3739 }
 0x32e   : > { %v3770_v47 = vpop.permute.xlu0 %3769 }
 0x32f   : > { %v3933_v44 = vrot.slane %v3770_v47, %v3826_v1  ;;  %v3900_v1 = vadd.s32 4294967192, %v5527_v63 }
 0x334   : > { %v5520_v58 = vpop.permute.xlu1 %3748 }
 0x339   : > { %v3773_v54 = vpop.permute.xlu0 %3772 }
 0x33a   : > { %v3938_v43 = vrot.slane %v3773_v54, %v3833_v7  ;;  %v3914_v7 = vadd.s32 4294967176, %v5527_v63 }
 0x33c   : > { %v3917_v24 = vsub.s32 %v3914_v7, %v4702_v17 }
 0x33f   : > { %v5524_v11 = vpop.permute.xlu1 %3742 }
 0x344   : > { %v5516_v56 = vpop.permute.xlu0 %3781 }
 0x345   : > { %v3953_v47 = vrot.slane %v5516_v56, %v3854_v39 }
 0x349   : > { %v3764_v62 = vpop.permute.xlu1 %3763 }
 0x34a   : > { %v3924_v9 = vrot.slane %v3764_v62, %v3814_v6  ;;  %v3879_v62 = vadd.s32 4294967216, %v5527_v63 }
 0x34f   : > { %v3776_v45 = vpop.permute.xlu0 %3775 }
 0x350   : > { %v3943_v25 = vrot.slane %v3776_v45, %v3840_v15  ;;  %v3875_v45 = vsub.s32 %v3872_v36, %v4702_v17  ;;  %v3903_v15 = vsub.s32 %v3900_v1, %v4702_v17 }
 0x354   : > { %v3767_v57 = vpop.permute.xlu1 %3766 }
 0x355   : > { %v3928_v8 = vrot.slane %v3767_v57, %v3819_v59  ;;  %v3862_v59 = vrot.slane %v5510_v21, %v3861_v42  ;;  %v3882_v21 = vsub.s32 %v3879_v62, %v4702_v17 }
 0x357   : > { %v3929_v10 = vsel %vm3821_vm2, %v3928_v8, %v3924_v9  ;;  %v3869_v8 = vrot.slane %v5518_v49, %v3868_v41  ;;  %v3886_v9 = vadd.s32 4294967208, %v5527_v63  ;;  %v3883_v48 = vrot.slane %v5514_v55, %v3882_v21 }
 0x358   : > { %v3934_v19 = vsel %vm3828_vm3, %v3933_v44, %v3929_v10 }
 0x359   : > { %v5522_v60 = vpop.permute.xlu0 %3784  ;;  %v3939_v50 = vsel %vm3835_vm4, %v3938_v43, %v3934_v19  ;;  %v3889_v23 = vsub.s32 %v3886_v9, %v4702_v17 }
 0x35a   : > { %v3944_v38 = vsel %vm3842_vm5, %v3943_v25, %v3939_v50  ;;  %v3958_v56 = vrot.slane %v5522_v60, %v3861_v42  ;;  %v3907_v60 = vadd.s32 4294967184, %v5527_v63 }
 0x35b   : > { %v3890_v28 = vrot.slane %v5520_v58, %v3889_v23 }
 0x35f   : > { %v5550_v20 = vpop.permute.xlu1 %3751 }
 0x364   : > { %v3779_v61 = vpop.permute.xlu0 %3778 }
 0x365   : > { %v3948_v26 = vrot.slane %v3779_v61, %v3847_v18  ;;  %v3855_v61 = vrot.slane %v5506_v14, %v3854_v39  ;;  %v3876_v14 = vrot.slane %v5524_v11, %v3875_v45  ;;  %v3910_v18 = vsub.s32 %v3907_v60, %v4702_v17 }
 0x367   : > { %v3949_v37 = vsel %vm3849_vm6, %v3948_v26, %v3944_v38  ;;  %v3857_v6 = vsel %vm3856_vm7, %v3855_v61, %v3850_v22  ;;  %v3897_v26 = vrot.slane %v5550_v20, %v3896_v3 }
 0x368   : > { %v3954_v4 = vsel %vm3856_vm7, %v3953_v47, %v3949_v37  ;;  %v3864_v49 = vsel %vm3863_vm8, %v3862_v59, %v3857_v6 }
 0x369   : > { %v3871_v11 = vsel %vm3870_vm9, %v3869_v8, %v3864_v49 }
 0x36a   : > { %v5566_v54 = vpop.permute.xlu1 %3754  ;;  %v3878_v43 = vsel %vm3877_vm10, %v3876_v14, %v3871_v11 }
 0x36b   : > { %v3904_v55 = vrot.slane %v5566_v54, %v3903_v15 }
 0x36f   : > { %v5530_v2 = vpop.permute.xlu0 %3793 }
 0x370   : > { %v3973_v19 = vrot.slane %v5530_v2, %v3882_v21  ;;  %v3885_v2 = vsel %vm3884_vm11, %v3883_v48, %v3878_v43 }
 0x371   : > { %v3892_v17 = vsel %vm3891_vm12, %v3890_v28, %v3885_v2 }
 0x372   : > { %v3899_v30 = vsel %vm3898_vm13, %v3897_v26, %v3892_v17 }
 0x373   : > { %v3906_v58 = vsel %vm3905_vm14, %v3904_v55, %v3899_v30 }
 0x374   : > { %v3758_v40 = vpop.permute.xlu1 %3757 }
 0x375   : > { %v3911_v29 = vrot.slane %v3758_v40, %v3910_v18 }
 0x377   : > { %v3913_v32 = vsel %vm3912_vm15, %v3911_v29, %v3906_v58 }
 0x37a   : > { %v5536_v13 = vpop.permute.xlu0 %3787 }
 0x37b   : > { %v3963_v57 = vrot.slane %v5536_v13, %v3868_v41  ;;  %v3959_v13 = vsel %vm3863_vm8, %v3958_v56, %v3954_v4 }
 0x37d   : > { %v3964_v44 = vsel %vm3870_vm9, %v3963_v57, %v3959_v13 }
 0x384   : > { %v5543_v0 = vpop.permute.xlu0 %3796 }
 0x385   : > { %v3978_v25 = vrot.slane %v5543_v0, %v3889_v23 }
 0x38a   : > { %v3791_v33 = vpop.permute.xlu0 %3790 }
 0x38b   : > { %v3968_v5 = vrot.slane %v3791_v33, %v3875_v45  ;;  %v3761_v33 = vpop.permute.xlu1 %3760 }
 0x38c   : > { %v3918_v0 = vrot.slane %v3761_v33, %v3917_v24 }
 0x38d   : > { %v3969_v12 = vsel %vm3877_vm10, %v3968_v5, %v3964_v44 }
 0x38e   : > { %v3974_v50 = vsel %vm3884_vm11, %v3973_v19, %v3969_v12  ;;  %v3920_v37 = vsel %vm3919_vm0, %v3918_v0, %v3913_v32 }
 0x38f   : > { %v5568_v52 = vpop.permute.xlu0 %3805  ;;  %v3979_v35 = vsel %vm3891_vm12, %v3978_v25, %v3974_v50 }
 0x390   : > { %v3993_v20 = vrot.slane %v5568_v52, %v3910_v18 }
 0x394   : > { %v3800_v10 = vpop.permute.xlu0 %3799 }
 0x395   : > { %v3983_v63 = vrot.slane %v3800_v10, %v3896_v3 }
 0x397   : > { %v3984_v38 = vsel %vm3898_vm13, %v3983_v63, %v3979_v35 }
 0x399   : > { %v3803_v51 = vpop.permute.xlu0 %3802 }
 0x39a   : > { %v3988_v27 = vrot.slane %v3803_v51, %v3903_v15 }
 0x39c   : > { %v3989_v31 = vsel %vm3905_vm14, %v3988_v27, %v3984_v38 }
 0x39d   : > { %v3994_v42 = vsel %vm3912_vm15, %v3993_v20, %v3989_v31 }
 0x39f   : > { %v3809_v36 = vpop.permute.xlu0 %3808 }
 0x3a0   : > { %v3998_v39 = vrot.slane %v3809_v36, %v3917_v24 }
 0x3a2   : > { %v3999_v53 = vsel %vm3919_vm0, %v3998_v39, %v3994_v42 }
 0x3a3   : > { %v4000_v41 = vcombine.low %v3920_v37, %v3999_v53 }
 0x3a5   : > { %v4007_v47 = vrot.slane %v4000_v41, %v4734_v34 }
 0x3a7   : > { %v4014_v54 = vrot.slane %v4007_v47, %v4734_v34 }
 0x3a9   : > { %4020 = vst.msk [vmem:[%s286_s25] sm:$0x3] %vm4018_vm1, %v4014_v54 }
 0x3aa   : > { %4325 = shalt.err (!%p4322_p3)
}
 0x3ab   : > { %s4326_s16 = scalar_lea.hbm %s5610_s10, 32  ;;  %s4330_s22 = scalar_lea.hbm %s5661_s7, 64 }
 0x3ac   : > { %p4327_p4 = scmp.ne.s32.totalorder %s5610_s10, %s4326_s16  ;;  %p4331_p9 = scmp.lt.u32.totalorder %s5610_s10, %s5661_s7 }
 0x3ad   : > { %p4332_p10 = scmp.lt.u32.totalorder %s4330_s22, %s4326_s16  ;;  %p4334_p12 = scmp.lt.u32.totalorder %s4326_s16, %s5610_s10 }
 0x3ae   : > { %p4328_p7 = pnand %p4327_p4, %p4457_p5 }
 0x3af   : > { %p4333_p11 = por %p4332_p10, %p4331_p9 }
 0x3b0   : > { %p4329_p8 = pneg %p4328_p7 }
 0x3b1   : > { %p4335_p13 = por %p4334_p12, %p4333_p11 }
 0x3b3   : > { %p4336_p0 = pnand %p4335_p13, %p4329_p8 }
 0x3b5   : > { %4339 = shalt.err (!%p4336_p0)
}
 0x3b6   : > { %4263 = dma.vmem_to_hbm [thread:$0]  (%p4457_p5), %s5612_s6, 32, %s5610_s10, %s4022_s14  }
 0x3b7 PF: > { %p4269_p1 = scmp.ge.s32.totalorder %s4374_s29, 2  ;;  %s4048_s25 = sand.u32 1, %s4362_s26  }
 0x3b8   : > { %s4049_s30 = scalar_lea.sflag [#allocation4], %s4048_s25 }
 0x3b9   : > { %p4266_p2 = pnand %p4269_p1, %p4461_p6 }
 0x3bb   : > { %4357 = dma.done.wait (!%p4266_p2), %s4049_s30, 32  }
 0x3bc   : > { %4359 = vsyncadd (!%p4266_p2), %s4049_s30, 4294967264  ;;  %p19_p3 = scmp.ge.s32.totalorder %s4445_s8, 4   ;;  %s5664_s26 = smov %s4366_s27 }
 0x3bd   : > { %s5665_s27 = smov %s4370_s28  ;;  %s5666_s28 = smov %s4455_s11 }
 0x3be   : > { %s5667_s29 = smov %s4445_s8  ;;  %21 = sbr.rel (!%p19_p3) target bundleno = 6 (0x6), region = 83 }
 0x3c5   :  { %4054 = vsyncpa [#allocation4], 1 }
 0x3c6   :  { %4056 = vsyncpa [#allocation4 + $0x1], 1 }

</bundles_post_ra>
